<compile_context>
chip_gen: v5e
topology: v5e:2x2
jax: 0.10.0
libtpu: 0.0.40
codegen_flags: <defaults>
</compile_context>

<pallas_src>
import functools

import jax
import jax.numpy as jnp
from jax import lax
from jax.experimental import pallas as pl
from jax.experimental.pallas import tpu as pltpu


def _round_up(x, m):
    return ((x + m - 1) // m) * m


def _tpu_generation():
    """Best-effort TPU generation detection (falls back to 'other')."""
    try:
        kind = jax.devices()[0].device_kind.lower().replace(" ", "")
    except Exception:
        return "other"
    if "v5lite" in kind or "v5e" in kind:
        return "v5e"
    if "v5" in kind:          # v5p: big VMEM, no bf16 VPU -> same knobs as v5e
        return "v5e"
    if "v6" in kind:
        return "v6e"
    if "v7" in kind or "tpu7" in kind:
        return "v7x"
    return "other"


def _gen_config(gen):
    """Per-generation VMEM budget / compute dtypes (all user-overridable)."""
    if gen == "v5e":
        # 128 MiB physical VMEM; HBM-bound; VPU has no bf16 -> f32 taps,
        # bf16 output to cut the dominant writeback traffic.
        return dict(budget=48 << 20, vmem_limit=96 << 20,
                    tap_dtype=jnp.float32, out_dtype=jnp.bfloat16)
    if gen == "v6e":
        # 128 MiB VMEM; VALU-bound tap loop -> bf16 taps.
        return dict(budget=48 << 20, vmem_limit=96 << 20,
                    tap_dtype=jnp.bfloat16, out_dtype=jnp.float32)
    # v7x (64 MiB VMEM / TC) and unknown chips: conservative VMEM, bf16 taps.
    return dict(budget=20 << 20, vmem_limit=32 << 20,
                tap_dtype=jnp.bfloat16, out_dtype=jnp.float32)


def _pick_row_tile(H, W, cin_p, cout_p, tap_bytes, out_bytes, budget_bytes,
                   max_rows=None, min_tiles=1):
    """Largest TH whose per-step working set fits the VMEM budget.

    TH need not divide H: the caller pads H to n_t * TH with zero rows (a zero
    input row is exactly conv2's zero padding because conv1 has no bias).
    """
    max_rows = H if max_rows is None else max(1, min(max_rows, H))

    def step_bytes(th):
        return (
            2 * (th + 2) * W * cin_p * 2              # bf16 input blocks (main+halos), x2 buffers
            + 2 * th * W * cout_p * out_bytes         # output block, x2 buffers
            + (th + 2) * W * cin_p * 2                # concatenated x_all value
            + 3 * (th + 2) * W * cout_p * tap_bytes   # y / y_left / y_right values
            + th * W * cout_p * 4                     # f32 accumulator
            + 2 * (cin_p * cout_p * 2 + 9 * cout_p * 4 + cout_p * 4))  # weights + bias

    th = 1
    for cand in range(1, max_rows + 1):
        if step_bytes(cand) <= budget_bytes:
            th = cand
        else:
            break
    # Even the tiles out (minimizes row padding) and honor the minimum tile
    # count (megacore balance on v7x when N == 1).  cdiv(H, cdiv(H, th)) <= th,
    # so the VMEM budget is still respected after evening out.
    n_t = max(pl.cdiv(H, th), min_tiles)
    th = pl.cdiv(H, n_t)
    n_t = max(pl.cdiv(H, th), min_tiles)
    return th, n_t


def _light_conv_kernel(x_ref, xt_ref, xb_ref, w1_ref, wd_ref, bias_ref, o_ref,
                       *, tap_dtype):
    # x_ref:    (TH, W, Cin_p)   bf16  main rows of this tile
    # xt_ref:   (1,  W, Cin_p)   bf16  row above the tile (clamped at the border)
    # xb_ref:   (1,  W, Cin_p)   bf16  row below the tile (clamped at the border)
    # w1_ref:   (Cin_p, Cout_p)  bf16  1x1 pointwise weight
    # wd_ref:   (9, Cout_p)      f32   depthwise 3x3 taps, BN scale pre-folded
    # bias_ref: (1, 1, Cout_p)   f32   folded BN bias
    # o_ref:    (TH, W, Cout_p)  out_dtype
    TH, W, Cin = x_ref.shape
    Cout = o_ref.shape[-1]
    t = pl.program_id(1)
    n_t = pl.num_programs(1)

    # Zero halo rows where the tile touches the image border; conv1 has no bias,
    # so a zero input row yields a zero y row == conv2's zero padding.
    top_ok = (t > 0).astype(x_ref.dtype)
    bot_ok = (t < n_t - 1).astype(x_ref.dtype)
    xt = xt_ref[...] * top_ok
    xb = xb_ref[...] * bot_ok

    # ---- 1x1 pointwise conv on main + halo rows: one MXU matmul, f32 acc ----
    x_all = jnp.concatenate([xt, x_ref[...], xb], axis=0)            # (TH+2, W, Cin)
    y = jnp.dot(x_all.reshape((TH + 2) * W, Cin), w1_ref[...],
                preferred_element_type=jnp.float32)
    # bf16 taps on v6e/v7x (bf16 VPU, widening f32 accumulate); f32 on v5e.
    y = y.reshape(TH + 2, W, Cout).astype(tap_dtype)

    # ---- depthwise 3x3 conv (padding=1), no VMEM scratch round-trip ----
    # Build the W-shifted copies once (zero border column baked in); the 9 taps
    # then only need cheap leading-dim (row) slices.
    # (A pltpu.roll variant would save these two copies on v5e's single vst
    #  slot, but the extra border masks land on the saturated VALU on v6e/v7x,
    #  so the generation-neutral concat form is kept.)
    zcol = jnp.zeros((TH + 2, 1, Cout), tap_dtype)
    y_l = jnp.concatenate([zcol, y[:, :W - 1, :]], axis=1)   # y_l[:, w] = y[:, w-1]
    y_r = jnp.concatenate([y[:, 1:, :], zcol], axis=1)       # y_r[:, w] = y[:, w+1]
    cols = (y_l, y, y_r)

    # f32 accumulator pre-loaded with the folded BN bias (saves one VALU pass).
    acc = jnp.broadcast_to(bias_ref[...], (TH, W, Cout))
    for di in range(3):
        for dj in range(3):
            tap = wd_ref[di * 3 + dj, :].astype(tap_dtype)   # (Cout,) lane broadcast
            acc = acc + tap * cols[dj][di:di + TH]

    # ---- ReLU + lane-dense store (Cout_p multiple of 128) ----
    o_ref[...] = jnp.maximum(acc, 0.0).astype(o_ref.dtype)


def light_conv3x3_nhwc(x_nhwc, w1, wd, bn_gamma, bn_beta, bn_mean, bn_var,
                       eps=1e-5, row_tile=None, tap_dtype=None, out_dtype=None,
                       keep_padded=False):
    """NHWC entry point.  x_nhwc: (N, H, W, Cin) -> (N, H, W, Cout[_padded]).

    keep_padded=True returns the channel-padded (Cout_p) output so chained NHWC
    consumers avoid the extra lane-slice HBM pass.
    """
    N, H, W, Cin = x_nhwc.shape
    Cout = w1.shape[0]                                  # w1: (Cout, Cin, 1, 1)
    Cin_p = _round_up(Cin, 128)                         # lane-dense K for the MXU
    Cout_p = _round_up(Cout, 128)                       # lane-dense N / output store

    cfg = _gen_config(_tpu_generation())
    tap_dtype = cfg["tap_dtype"] if tap_dtype is None else tap_dtype
    out_dtype = cfg["out_dtype"] if out_dtype is None else out_dtype
    tap_bytes = jnp.dtype(tap_dtype).itemsize
    out_bytes = jnp.dtype(out_dtype).itemsize

    # Row tiling: generation-aware VMEM budget; >= 2 row tiles when N == 1 so
    # both v7x TensorCores get work (both grid axes are "parallel").
    TH, n_t = _pick_row_tile(H, W, Cin_p, Cout_p, tap_bytes, out_bytes,
                             budget_bytes=cfg["budget"], max_rows=row_tile,
                             min_tiles=2 if N == 1 else 1)
    H_pad = TH * n_t

    # ---- parameter prep (plain JAX): fold BN into weights / bias ----
    scale = bn_gamma / jnp.sqrt(bn_var + eps)           # (Cout,)
    bias = bn_beta - bn_mean * scale

    w1_k = jnp.transpose(w1[:, :, 0, 0], (1, 0))        # (Cin, Cout)
    w1_k = jnp.pad(w1_k, ((0, Cin_p - Cin), (0, Cout_p - Cout))).astype(jnp.bfloat16)

    wd_k = jnp.transpose(wd[:, 0, :, :], (1, 2, 0)).reshape(9, Cout)  # (kh*3+kw, Cout)
    wd_k = wd_k * scale[None, :]                        # fold BN scale (both per-channel linear)
    wd_k = jnp.pad(wd_k, ((0, 0), (0, Cout_p - Cout))).astype(jnp.float32)

    bias_k = jnp.pad(bias, (0, Cout_p - Cout)).reshape(1, 1, Cout_p).astype(jnp.float32)

    x_k = x_nhwc
    if Cin_p != Cin or H_pad != H:
        x_k = jnp.pad(x_k, ((0, 0), (0, H_pad - H), (0, 0), (0, Cin_p - Cin)))
    x_k = x_k.astype(jnp.bfloat16)

    # Advisory cost estimate (includes per-step halo re-read / recompute).
    flops = N * n_t * ((TH + 2) * W * 2 * Cin_p * Cout_p + TH * W * 20 * Cout_p)
    bytes_accessed = (N * n_t * ((TH + 2) * W * Cin_p * 2 + TH * W * Cout_p * out_bytes)
                      + Cin_p * Cout_p * 2 + 9 * Cout_p * 4 + Cout_p * 4)

    kernel = functools.partial(_light_conv_kernel, tap_dtype=tap_dtype)

    out = pl.pallas_call(
        kernel,
        out_shape=jax.ShapeDtypeStruct((N, H_pad, W, Cout_p), out_dtype),
        grid_spec=pltpu.PrefetchScalarGridSpec(
            num_scalar_prefetch=0,
            grid=(N, n_t),
            in_specs=[
                # main TH rows of this tile
                pl.BlockSpec((None, TH, W, Cin_p), lambda n, t: (n, t, 0, 0)),
                # 1-row halo above (clamped; zeroed in-kernel at t == 0)
                pl.BlockSpec((None, 1, W, Cin_p),
                             lambda n, t: (n, jnp.maximum(t * TH - 1, 0), 0, 0)),
                # 1-row halo below (clamped; zeroed in-kernel at t == n_t - 1)
                pl.BlockSpec((None, 1, W, Cin_p),
                             lambda n, t: (n, jnp.minimum(t * TH + TH, H_pad - 1), 0, 0)),
                pl.BlockSpec((Cin_p, Cout_p), lambda n, t: (0, 0)),
                pl.BlockSpec((9, Cout_p), lambda n, t: (0, 0)),
                pl.BlockSpec((1, 1, Cout_p), lambda n, t: (0, 0, 0)),
            ],
            out_specs=pl.BlockSpec((None, TH, W, Cout_p), lambda n, t: (n, t, 0, 0)),
        ),
        compiler_params=pltpu.CompilerParams(
            dimension_semantics=("parallel", "parallel"),
            vmem_limit_bytes=cfg["vmem_limit"]),
        cost_estimate=pl.CostEstimate(flops=flops, transcendentals=0,
                                      bytes_accessed=bytes_accessed),
    )(x_k, x_k, x_k, w1_k, wd_k, bias_k)

    if H_pad != H:
        out = out[:, :H]
    if not keep_padded and Cout_p != Cout:
        out = out[..., :Cout]
    return out


def light_conv3x3(x_nchw, w1, wd, bn_gamma, bn_beta, bn_mean, bn_var,
                  eps=1e-5, row_tile=None, tap_dtype=None, out_dtype=None):
    """NCHW wrapper matching the PyTorch module interface.

    TODO(synk): for production keep activations channel-padded NHWC end-to-end
    (light_conv3x3_nhwc with keep_padded=True); these transposes and the
    trailing channel slice are full extra HBM passes.
    """
    x_nhwc = jnp.transpose(x_nchw, (0, 2, 3, 1))
    out_nhwc = light_conv3x3_nhwc(x_nhwc, w1, wd, bn_gamma, bn_beta, bn_mean,
                                  bn_var, eps=eps, row_tile=row_tile,
                                  tap_dtype=tap_dtype, out_dtype=out_dtype)
    return jnp.transpose(out_nhwc, (0, 3, 1, 2))


def _reference(x, w1, wd, gamma, beta, mean, var, eps=1e-5):
    """Pure-JAX (lax.conv) reference, NCHW, f32."""
    Cout = w1.shape[0]
    y = lax.conv_general_dilated(
        x, w1, window_strides=(1, 1), padding="VALID",
        dimension_numbers=("NCHW", "OIHW", "NCHW"))
    z = lax.conv_general_dilated(
        y, wd, window_strides=(1, 1), padding=((1, 1), (1, 1)),
        dimension_numbers=("NCHW", "OIHW", "NCHW"),
        feature_group_count=Cout)
    scale = gamma / jnp.sqrt(var + eps)
    bias = beta - mean * scale
    z = z * scale[None, :, None, None] + bias[None, :, None, None]
    return jnp.maximum(z, 0.0)


if __name__ == "__main__":
    N, Cin, Cout, H, W = 2, 4, 8, 16, 16

    key = jax.random.PRNGKey(0)
    k_x, k_w1, k_wd, k_g, k_b, k_m, k_v = jax.random.split(key, 7)

    x = jax.random.normal(k_x, (N, Cin, H, W), dtype=jnp.float32)
    w1 = jax.random.normal(k_w1, (Cout, Cin, 1, 1), dtype=jnp.float32) * 0.1
    wd = jax.random.normal(k_wd, (Cout, 1, 3, 3), dtype=jnp.float32) * 0.1
    # Non-trivial BN params (eval-mode stats) so the scale/bias folding is exercised.
    gamma = 1.0 + 0.2 * jax.random.normal(k_g, (Cout,), dtype=jnp.float32)
    beta = 0.1 * jax.random.normal(k_b, (Cout,), dtype=jnp.float32)
    mean = 0.1 * jax.random.normal(k_m, (Cout,), dtype=jnp.float32)
    var = 1.0 + 0.2 * jnp.abs(jax.random.normal(k_v, (Cout,), dtype=jnp.float32))

    # row_tile=8 -> grid (N=2, n_t=2): exercises both the interior-halo and the
    # border-masking paths at this demo size.
    out = light_conv3x3(x, w1, wd, gamma, beta, mean, var, row_tile=8)
    out = jax.block_until_ready(out)

    ref = _reference(x, w1, wd, gamma, beta, mean, var)
    assert out.shape == (N, Cout, H, W)
    # bf16 MXU inputs + (on v6e/v7x) bf16 tap MAC / (on v5e) bf16 output
    # -> relaxed tolerance vs the pure-f32 reference.
    assert jnp.allclose(out.astype(jnp.float32), ref, atol=2e-2, rtol=2e-2), \
        "mismatch vs reference"

    print("KERNEL_OK")
</pallas_src>

<mosaic_0001>
module attributes {stable_mosaic.version = 11 : i64} {
  func.func @_light_conv_kernel(%arg0: i32, %arg1: i32, %arg2: memref<1x8x16x128xbf16, #tpu.memory_space<vmem>>, %arg3: memref<1x1x16x128xbf16, #tpu.memory_space<vmem>>, %arg4: memref<1x1x16x128xbf16, #tpu.memory_space<vmem>>, %arg5: memref<128x128xbf16, #tpu.memory_space<vmem>>, %arg6: memref<9x128xf32, #tpu.memory_space<vmem>>, %arg7: memref<1x1x128xf32, #tpu.memory_space<vmem>>, %arg8: memref<1x8x16x128xf32, #tpu.memory_space<vmem>>) attributes {dimension_semantics = [#tpu.dimension_semantics<parallel>, #tpu.dimension_semantics<parallel>], iteration_bounds = array<i64: 2, 2>, scalar_prefetch = 0 : i64, scratch_operands = 0 : i64, tpu.core_type = #tpu.core_type<tc>, window_params = [{transform_indices = @transform_0, window_bounds = array<i64: 1, 8, 16, 128>}, {transform_indices = @transform_1, window_bounds = array<i64: 1, 1, 16, 128>}, {transform_indices = @transform_2, window_bounds = array<i64: 1, 1, 16, 128>}, {pipeline_mode = #tpu.pipeline_mode<synchronous>, transform_indices = @transform_3, window_bounds = array<i64: 128, 128>}, {pipeline_mode = #tpu.pipeline_mode<synchronous>, transform_indices = @transform_4, window_bounds = array<i64: 9, 128>}, {pipeline_mode = #tpu.pipeline_mode<synchronous>, transform_indices = @transform_5, window_bounds = array<i64: 1, 1, 128>}, {transform_indices = @transform_6, window_bounds = array<i64: 1, 8, 16, 128>}]} {
    %c0_i32 = arith.constant 0 : i32
    %0 = arith.cmpi sgt, %arg1, %c0_i32 : i32
    %1 = arith.extui %0 : i1 to i32
    %2 = arith.sitofp %1 : i32 to f32
    %3 = arith.truncf %2 : f32 to bf16
    %c1_i32 = arith.constant 1 : i32
    %4 = arith.cmpi slt, %arg1, %c1_i32 : i32
    %5 = arith.extui %4 : i1 to i32
    %6 = arith.sitofp %5 : i32 to f32
    %7 = arith.truncf %6 : f32 to bf16
    %c0 = arith.constant 0 : index
    %c0_0 = arith.constant 0 : index
    %c0_1 = arith.constant 0 : index
    %c0_2 = arith.constant 0 : index
    %8 = vector.load %arg3[%c0, %c0_0, %c0_1, %c0_2] : memref<1x1x16x128xbf16, #tpu.memory_space<vmem>>, vector<1x1x16x128xbf16>
    %9 = vector.shape_cast %8 : vector<1x1x16x128xbf16> to vector<1x16x128xbf16>
    %10 = vector.broadcast %3 : bf16 to vector<1x16x128xbf16>
    %11 = arith.mulf %9, %10 : vector<1x16x128xbf16>
    %c0_3 = arith.constant 0 : index
    %c0_4 = arith.constant 0 : index
    %c0_5 = arith.constant 0 : index
    %c0_6 = arith.constant 0 : index
    %12 = vector.load %arg4[%c0_3, %c0_4, %c0_5, %c0_6] : memref<1x1x16x128xbf16, #tpu.memory_space<vmem>>, vector<1x1x16x128xbf16>
    %13 = vector.shape_cast %12 : vector<1x1x16x128xbf16> to vector<1x16x128xbf16>
    %14 = vector.broadcast %7 : bf16 to vector<1x16x128xbf16>
    %15 = arith.mulf %13, %14 : vector<1x16x128xbf16>
    %c0_7 = arith.constant 0 : index
    %c0_8 = arith.constant 0 : index
    %c0_9 = arith.constant 0 : index
    %c0_10 = arith.constant 0 : index
    %16 = vector.load %arg2[%c0_7, %c0_8, %c0_9, %c0_10] : memref<1x8x16x128xbf16, #tpu.memory_space<vmem>>, vector<1x8x16x128xbf16>
    %17 = vector.shape_cast %16 : vector<1x8x16x128xbf16> to vector<8x16x128xbf16>
    %18 = tpu.concatenate %11, %17, %15 in 0 : vector<1x16x128xbf16>, vector<8x16x128xbf16>, vector<1x16x128xbf16> -> vector<10x16x128xbf16>
    %19 = vector.shape_cast %18 : vector<10x16x128xbf16> to vector<160x128xbf16>
    %c0_11 = arith.constant 0 : index
    %c0_12 = arith.constant 0 : index
    %20 = vector.load %arg5[%c0_11, %c0_12] : memref<128x128xbf16, #tpu.memory_space<vmem>>, vector<128x128xbf16>
    %cst = arith.constant dense<0.000000e+00> : vector<160x128xf32>
    %21 = tpu.matmul %19, %20, %cst {dimension_numbers = #tpu.dot_dimension_numbers<[1], [0], [0], [1], [0, 0, 1, 1], [], []>} : vector<160x128xbf16>, vector<128x128xbf16>, vector<160x128xf32> -> vector<160x128xf32>
    %22 = vector.shape_cast %21 : vector<160x128xf32> to vector<10x16x128xf32>
    %23 = arith.truncf %22 : vector<10x16x128xf32> to vector<10x16x128xbf16>
    %cst_13 = arith.constant 0.000000e+00 : bf16
    %24 = vector.broadcast %cst_13 : bf16 to vector<10x1x128xbf16>
    %25 = vector.extract_strided_slice %23 {offsets = [0, 0, 0], sizes = [10, 15, 128], strides = [1, 1, 1]} : vector<10x16x128xbf16> to vector<10x15x128xbf16>
    %26 = tpu.concatenate %24, %25 in 1 : vector<10x1x128xbf16>, vector<10x15x128xbf16> -> vector<10x16x128xbf16>
    %27 = vector.extract_strided_slice %23 {offsets = [0, 1, 0], sizes = [10, 15, 128], strides = [1, 1, 1]} : vector<10x16x128xbf16> to vector<10x15x128xbf16>
    %28 = tpu.concatenate %27, %24 in 1 : vector<10x15x128xbf16>, vector<10x1x128xbf16> -> vector<10x16x128xbf16>
    %c0_14 = arith.constant 0 : index
    %c0_15 = arith.constant 0 : index
    %c0_16 = arith.constant 0 : index
    %29 = vector.load %arg7[%c0_14, %c0_15, %c0_16] : memref<1x1x128xf32, #tpu.memory_space<vmem>>, vector<1x1x128xf32>
    %30 = vector.shape_cast %29 : vector<1x1x128xf32> to vector<1x1x128xf32>
    %31 = vector.broadcast %30 : vector<1x1x128xf32> to vector<8x16x128xf32>
    %c0_17 = arith.constant 0 : index
    %c0_18 = arith.constant 0 : index
    %32 = vector.load %arg6[%c0_17, %c0_18] : memref<9x128xf32, #tpu.memory_space<vmem>>, vector<1x128xf32>
    %33 = vector.shape_cast %32 : vector<1x128xf32> to vector<128xf32>
    %34 = arith.truncf %33 : vector<128xf32> to vector<128xbf16>
    %35 = vector.extract_strided_slice %26 {offsets = [0, 0, 0], sizes = [8, 16, 128], strides = [1, 1, 1]} : vector<10x16x128xbf16> to vector<8x16x128xbf16>
    %36 = vector.shape_cast %34 : vector<128xbf16> to vector<1x1x128xbf16>
    %37 = vector.broadcast %36 : vector<1x1x128xbf16> to vector<8x16x128xbf16>
    %38 = arith.mulf %37, %35 : vector<8x16x128xbf16>
    %39 = arith.extf %38 : vector<8x16x128xbf16> to vector<8x16x128xf32>
    %40 = arith.addf %31, %39 : vector<8x16x128xf32>
    %c1 = arith.constant 1 : index
    %c0_19 = arith.constant 0 : index
    %41 = vector.load %arg6[%c1, %c0_19] : memref<9x128xf32, #tpu.memory_space<vmem>>, vector<1x128xf32>
    %42 = vector.shape_cast %41 : vector<1x128xf32> to vector<128xf32>
    %43 = arith.truncf %42 : vector<128xf32> to vector<128xbf16>
    %44 = vector.extract_strided_slice %23 {offsets = [0, 0, 0], sizes = [8, 16, 128], strides = [1, 1, 1]} : vector<10x16x128xbf16> to vector<8x16x128xbf16>
    %45 = vector.shape_cast %43 : vector<128xbf16> to vector<1x1x128xbf16>
    %46 = vector.broadcast %45 : vector<1x1x128xbf16> to vector<8x16x128xbf16>
    %47 = arith.mulf %46, %44 : vector<8x16x128xbf16>
    %48 = arith.extf %47 : vector<8x16x128xbf16> to vector<8x16x128xf32>
    %49 = arith.addf %40, %48 : vector<8x16x128xf32>
    %c2 = arith.constant 2 : index
    %c0_20 = arith.constant 0 : index
    %50 = vector.load %arg6[%c2, %c0_20] : memref<9x128xf32, #tpu.memory_space<vmem>>, vector<1x128xf32>
    %51 = vector.shape_cast %50 : vector<1x128xf32> to vector<128xf32>
    %52 = arith.truncf %51 : vector<128xf32> to vector<128xbf16>
    %53 = vector.extract_strided_slice %28 {offsets = [0, 0, 0], sizes = [8, 16, 128], strides = [1, 1, 1]} : vector<10x16x128xbf16> to vector<8x16x128xbf16>
    %54 = vector.shape_cast %52 : vector<128xbf16> to vector<1x1x128xbf16>
    %55 = vector.broadcast %54 : vector<1x1x128xbf16> to vector<8x16x128xbf16>
    %56 = arith.mulf %55, %53 : vector<8x16x128xbf16>
    %57 = arith.extf %56 : vector<8x16x128xbf16> to vector<8x16x128xf32>
    %58 = arith.addf %49, %57 : vector<8x16x128xf32>
    %c3 = arith.constant 3 : index
    %c0_21 = arith.constant 0 : index
    %59 = vector.load %arg6[%c3, %c0_21] : memref<9x128xf32, #tpu.memory_space<vmem>>, vector<1x128xf32>
    %60 = vector.shape_cast %59 : vector<1x128xf32> to vector<128xf32>
    %61 = arith.truncf %60 : vector<128xf32> to vector<128xbf16>
    %62 = vector.extract_strided_slice %26 {offsets = [1, 0, 0], sizes = [8, 16, 128], strides = [1, 1, 1]} : vector<10x16x128xbf16> to vector<8x16x128xbf16>
    %63 = vector.shape_cast %61 : vector<128xbf16> to vector<1x1x128xbf16>
    %64 = vector.broadcast %63 : vector<1x1x128xbf16> to vector<8x16x128xbf16>
    %65 = arith.mulf %64, %62 : vector<8x16x128xbf16>
    %66 = arith.extf %65 : vector<8x16x128xbf16> to vector<8x16x128xf32>
    %67 = arith.addf %58, %66 : vector<8x16x128xf32>
    %c4 = arith.constant 4 : index
    %c0_22 = arith.constant 0 : index
    %68 = vector.load %arg6[%c4, %c0_22] : memref<9x128xf32, #tpu.memory_space<vmem>>, vector<1x128xf32>
    %69 = vector.shape_cast %68 : vector<1x128xf32> to vector<128xf32>
    %70 = arith.truncf %69 : vector<128xf32> to vector<128xbf16>
    %71 = vector.extract_strided_slice %23 {offsets = [1, 0, 0], sizes = [8, 16, 128], strides = [1, 1, 1]} : vector<10x16x128xbf16> to vector<8x16x128xbf16>
    %72 = vector.shape_cast %70 : vector<128xbf16> to vector<1x1x128xbf16>
    %73 = vector.broadcast %72 : vector<1x1x128xbf16> to vector<8x16x128xbf16>
    %74 = arith.mulf %73, %71 : vector<8x16x128xbf16>
    %75 = arith.extf %74 : vector<8x16x128xbf16> to vector<8x16x128xf32>
    %76 = arith.addf %67, %75 : vector<8x16x128xf32>
    %c5 = arith.constant 5 : index
    %c0_23 = arith.constant 0 : index
    %77 = vector.load %arg6[%c5, %c0_23] : memref<9x128xf32, #tpu.memory_space<vmem>>, vector<1x128xf32>
    %78 = vector.shape_cast %77 : vector<1x128xf32> to vector<128xf32>
    %79 = arith.truncf %78 : vector<128xf32> to vector<128xbf16>
    %80 = vector.extract_strided_slice %28 {offsets = [1, 0, 0], sizes = [8, 16, 128], strides = [1, 1, 1]} : vector<10x16x128xbf16> to vector<8x16x128xbf16>
    %81 = vector.shape_cast %79 : vector<128xbf16> to vector<1x1x128xbf16>
    %82 = vector.broadcast %81 : vector<1x1x128xbf16> to vector<8x16x128xbf16>
    %83 = arith.mulf %82, %80 : vector<8x16x128xbf16>
    %84 = arith.extf %83 : vector<8x16x128xbf16> to vector<8x16x128xf32>
    %85 = arith.addf %76, %84 : vector<8x16x128xf32>
    %c6 = arith.constant 6 : index
    %c0_24 = arith.constant 0 : index
    %86 = vector.load %arg6[%c6, %c0_24] : memref<9x128xf32, #tpu.memory_space<vmem>>, vector<1x128xf32>
    %87 = vector.shape_cast %86 : vector<1x128xf32> to vector<128xf32>
    %88 = arith.truncf %87 : vector<128xf32> to vector<128xbf16>
    %89 = vector.extract_strided_slice %26 {offsets = [2, 0, 0], sizes = [8, 16, 128], strides = [1, 1, 1]} : vector<10x16x128xbf16> to vector<8x16x128xbf16>
    %90 = vector.shape_cast %88 : vector<128xbf16> to vector<1x1x128xbf16>
    %91 = vector.broadcast %90 : vector<1x1x128xbf16> to vector<8x16x128xbf16>
    %92 = arith.mulf %91, %89 : vector<8x16x128xbf16>
    %93 = arith.extf %92 : vector<8x16x128xbf16> to vector<8x16x128xf32>
    %94 = arith.addf %85, %93 : vector<8x16x128xf32>
    %c7 = arith.constant 7 : index
    %c0_25 = arith.constant 0 : index
    %95 = vector.load %arg6[%c7, %c0_25] : memref<9x128xf32, #tpu.memory_space<vmem>>, vector<1x128xf32>
    %96 = vector.shape_cast %95 : vector<1x128xf32> to vector<128xf32>
    %97 = arith.truncf %96 : vector<128xf32> to vector<128xbf16>
    %98 = vector.extract_strided_slice %23 {offsets = [2, 0, 0], sizes = [8, 16, 128], strides = [1, 1, 1]} : vector<10x16x128xbf16> to vector<8x16x128xbf16>
    %99 = vector.shape_cast %97 : vector<128xbf16> to vector<1x1x128xbf16>
    %100 = vector.broadcast %99 : vector<1x1x128xbf16> to vector<8x16x128xbf16>
    %101 = arith.mulf %100, %98 : vector<8x16x128xbf16>
    %102 = arith.extf %101 : vector<8x16x128xbf16> to vector<8x16x128xf32>
    %103 = arith.addf %94, %102 : vector<8x16x128xf32>
    %c8 = arith.constant 8 : index
    %c0_26 = arith.constant 0 : index
    %104 = vector.load %arg6[%c8, %c0_26] : memref<9x128xf32, #tpu.memory_space<vmem>>, vector<1x128xf32>
    %105 = vector.shape_cast %104 : vector<1x128xf32> to vector<128xf32>
    %106 = arith.truncf %105 : vector<128xf32> to vector<128xbf16>
    %107 = vector.extract_strided_slice %28 {offsets = [2, 0, 0], sizes = [8, 16, 128], strides = [1, 1, 1]} : vector<10x16x128xbf16> to vector<8x16x128xbf16>
    %108 = vector.shape_cast %106 : vector<128xbf16> to vector<1x1x128xbf16>
    %109 = vector.broadcast %108 : vector<1x1x128xbf16> to vector<8x16x128xbf16>
    %110 = arith.mulf %109, %107 : vector<8x16x128xbf16>
    %111 = arith.extf %110 : vector<8x16x128xbf16> to vector<8x16x128xf32>
    %112 = arith.addf %103, %111 : vector<8x16x128xf32>
    %cst_27 = arith.constant 0.000000e+00 : f32
    %113 = vector.broadcast %cst_27 : f32 to vector<8x16x128xf32>
    %114 = arith.maximumf %112, %113 : vector<8x16x128xf32>
    %c0_28 = arith.constant 0 : index
    %c0_29 = arith.constant 0 : index
    %c0_30 = arith.constant 0 : index
    %c0_31 = arith.constant 0 : index
    %115 = vector.load %arg8[%c0_28, %c0_29, %c0_30, %c0_31] : memref<1x8x16x128xf32, #tpu.memory_space<vmem>>, vector<1x8x16x128xf32>
    %116 = vector.shape_cast %115 : vector<1x8x16x128xf32> to vector<8x16x128xf32>
    %117 = vector.shape_cast %114 : vector<8x16x128xf32> to vector<1x8x16x128xf32>
    tpu.vector_store %arg8[%c0_28, %c0_29, %c0_30, %c0_31], %117 {strides = array<i32>} : memref<1x8x16x128xf32, #tpu.memory_space<vmem>>, vector<1x8x16x128xf32>,
    return
  }
  func.func @transform_0(%arg0: i32, %arg1: i32) -> (i32, i32, i32, i32) {
    %c0_i32 = arith.constant 0 : i32
    %c0_i32_0 = arith.constant 0 : i32
    %c0_i32_1 = arith.constant 0 : i32
    return %arg0, %arg1, %c0_i32, %c0_i32_0 : i32, i32, i32, i32
  }
  func.func @transform_1(%arg0: i32, %arg1: i32) -> (i32, i32, i32, i32) {
    %c8_i32 = arith.constant 8 : i32
    %0 = arith.muli %arg1, %c8_i32 : i32
    %c1_i32 = arith.constant 1 : i32
    %1 = arith.subi %0, %c1_i32 : i32
    %c0_i32 = arith.constant 0 : i32
    %2 = arith.maxsi %1, %c0_i32 : i32
    %c0_i32_0 = arith.constant 0 : i32
    %c0_i32_1 = arith.constant 0 : i32
    %c0_i32_2 = arith.constant 0 : i32
    return %arg0, %2, %c0_i32_0, %c0_i32_1 : i32, i32, i32, i32
  }
  func.func @transform_2(%arg0: i32, %arg1: i32) -> (i32, i32, i32, i32) {
    %c8_i32 = arith.constant 8 : i32
    %0 = arith.muli %arg1, %c8_i32 : i32
    %c8_i32_0 = arith.constant 8 : i32
    %1 = arith.addi %0, %c8_i32_0 : i32
    %c15_i32 = arith.constant 15 : i32
    %2 = arith.minsi %1, %c15_i32 : i32
    %c0_i32 = arith.constant 0 : i32
    %c0_i32_1 = arith.constant 0 : i32
    %c0_i32_2 = arith.constant 0 : i32
    return %arg0, %2, %c0_i32, %c0_i32_1 : i32, i32, i32, i32
  }
  func.func @transform_3(%arg0: i32, %arg1: i32) -> (i32, i32) {
    %c0_i32 = arith.constant 0 : i32
    %c0_i32_0 = arith.constant 0 : i32
    %c0_i32_1 = arith.constant 0 : i32
    return %c0_i32, %c0_i32_0 : i32, i32
  }
  func.func @transform_4(%arg0: i32, %arg1: i32) -> (i32, i32) {
    %c0_i32 = arith.constant 0 : i32
    %c0_i32_0 = arith.constant 0 : i32
    %c0_i32_1 = arith.constant 0 : i32
    return %c0_i32, %c0_i32_0 : i32, i32
  }
  func.func @transform_5(%arg0: i32, %arg1: i32) -> (i32, i32, i32) {
    %c0_i32 = arith.constant 0 : i32
    %c0_i32_0 = arith.constant 0 : i32
    %c0_i32_1 = arith.constant 0 : i32
    %c0_i32_2 = arith.constant 0 : i32
    return %c0_i32, %c0_i32_0, %c0_i32_1 : i32, i32, i32
  }
  func.func @transform_6(%arg0: i32, %arg1: i32) -> (i32, i32, i32, i32) {
    %c0_i32 = arith.constant 0 : i32
    %c0_i32_0 = arith.constant 0 : i32
    %c0_i32_1 = arith.constant 0 : i32
    return %arg0, %arg1, %c0_i32, %c0_i32_0 : i32, i32, i32, i32
  }
}

</mosaic_0001>

<bundles_post_ra>
// kernel: tpu_custom_call.1
= control target key start
LH: loop header
LB: loop body
LE: loop exit
PB: predicated region body
PF: predicated region fallthrough
CT: control target
= control target key end

     0   :  { %s3539_s0 = inlined_call_operand.hbm [shape: bf16[2,16,16,128], index: 0, kind: input, shape index: {}]   ;;  %s3540_s1 = inlined_call_operand.hbm [shape: bf16[2,16,16,128], index: 1, kind: input, shape index: {}]   ;;  %s3541_s2 = inlined_call_operand.hbm [shape: bf16[2,16,16,128], index: 2, kind: input, shape index: {}]   ;;  %s3542_s3 = inlined_call_operand.hbm [shape: bf16[128,128], index: 3, kind: input, shape index: {}]   ;;  %s3543_s4 = inlined_call_operand.hbm [shape: f32[9,128], index: 4, kind: input, shape index: {}]   ;;  %s3544_s5 = inlined_call_operand.vmem [shape: f32[1,1,128], index: 5, kind: input, shape index: {}]   ;;  %s3545_s6 = inlined_call_operand.hbm [shape: f32[2,16,16,128], index: 6, kind: output, shape index: {}]  }
   0x1   :  { %3583 = sst [smem:[#allocation74_spill]] %s3539_s0 }
   0x2   :  { %3584 = sst [smem:[#allocation75_spill]] %s3540_s1 }
   0x3   :  { %3585 = sst [smem:[#allocation76_spill]] %s3541_s2 }
   0x4   :  { %3586 = sst [smem:[#allocation77_spill]] %s3542_s3 }
   0x5   :  { %3587 = sst [smem:[#allocation78_spill]] %s3543_s4 }
   0x6   :  { %3588 = sst [smem:[#allocation79_spill]] %s3544_s5 }
   0x7   :  { %3589 = sst [smem:[#allocation80_spill]] %s3545_s6 }
   0x8   :  { %11 = vsyncpa [#allocation3], 0 }
   0x9   :  { %13 = vsyncpa [#allocation3 + $0x1], 0 }
   0xa   :  { %14 = vsyncpa [#allocation6], 0 }
   0xb   :  { %16 = vsyncpa [#allocation6 + $0x1], 0 }
   0xc   :  { %17 = vsyncpa [#allocation9], 0 }
   0xd   :  { %18 = vsyncpa [#allocation4], 0 }
   0xe   :  { %20 = vsyncpa [#allocation4 + $0x1], 0  ;;  %s2491_s21 = smov 0   ;;  %s2493_s22 = smov 0  }
   0xf   :  { %s2495_s23 = smov 0   ;;  %s2497_s24 = smov 0  }
  0x10   :  { %s2499_s25 = smov 0   ;;  %s2501_s26 = smov 0  }
  0x11   :  { %s2503_s27 = smov 0   ;;  %s2505_s28 = smov 0  }
  0x12   :  { %s2507_s29 = smov 0   ;;  %s2509_s30 = smov 0  }
  0x13   :  { %s2511_s7 = smov 0   ;;  %s2513_s8 = smov 0  }
  0x14   :  { %s2515_s9 = smov 0   ;;  %s2517_s10 = smov 0  }
  0x15 LB: > { %3590 = sst [smem:[#allocation17_spill]] %s2394_s21  ;;  %s2562_s11 = sadd.s32 4294967295, %s2446_s10   ;;  %s2446_s10 = sphi %s2517_s10, %s26_s10   ;;  %s2442_s9 = sphi %s2515_s9, %s3740_s9   ;;  %s2438_s8 = sphi %s2513_s8, %s3739_s8   ;;  %s2434_s7 = sphi %s2511_s7, %s3746_s7   ;;  %s2430_s30 = sphi %s2509_s30, %s3737_s30   ;;  %s2426_s29 = sphi %s2507_s29, %s3736_s29   ;;  %s2422_s28 = sphi %s2505_s28, %s3745_s28   ;;  %s2418_s27 = sphi %s2503_s27, %s3744_s27   ;;  %s2414_s26 = sphi %s2501_s26, %s3734_s26   ;;  %s2410_s25 = sphi %s2499_s25, %s3733_s25   ;;  %s2406_s24 = sphi %s2497_s24, %s3732_s24   ;;  %s2402_s23 = sphi %s2495_s23, %s3743_s23   ;;  %s2398_s22 = sphi %s2493_s22, %s3742_s22   ;;  %s2394_s21 = sphi %s2491_s21, %s3741_s21  }
  0x16   : > { %3591 = sst [smem:[#allocation18_spill]] %s2410_s25  ;;  %p1825_p0 = scmp.ge.s32.totalorder %s2446_s10, 1 }
  0x17   : > { %3592 = sst [smem:[#allocation19_spill]] %s2414_s26  ;;  %p61_p1 = scmp.eq.s32.totalorder %s2562_s11, 0 }
  0x18   : > { %3593 = sst [smem:[#allocation20_spill]] %s2426_s29  ;;  %p234_p2 = scmp.lt.s32.totalorder %s2446_s10, 5 }
  0x19   : > { %3594 = sst [smem:[#allocation21_spill]] %s2430_s30  ;;  %s2448_s16 = smov [#allocation8]  }
  0x1a   : > { %3595 = sst [smem:[#allocation22_spill]] %s2434_s7  ;;  %p2570_p3 = pnand %p1825_p0, %p234_p2 }
  0x1b   : > { %3596 = sst [smem:[#allocation23_spill]] %s2438_s8  ;;  %s247_s17 = sshll.u32 %s2448_s16, 4  ;;  %s248_s17 = int_to_ptr.vmem [resolvable:$true] %s247_s17 }
  0x1c   : > { %3597 = sst [smem:[#allocation24_spill]] %s2442_s9  ;;  %p1989_p4 = pneg %p2570_p3 }
  0x1d   : > { %s3598_s3 = sld [smem:[#allocation77_spill]]  ;;  %s3547_s19 = smov 64  }
  0x1e   : > { %s3599_s15 = scalar_select %p2570_p3, 1, 0 }
  0x1f   : > { %p2578_p5 = pnand %p1989_p4, %p61_p1  ;;  %s3549_s20 = smov 4  }
  0x20   : > { %3600 = sst [smem:[#allocation25_spill]] %s3599_s15  ;;  %s35_s12 = sadd.s32 1, %s2438_s8 }
  0x21   : > { %p36_p6 = scmp.ge.s32.totalorder %s35_s12, 2  ;;  %s38_s13 = sadd.s32 1, %s2442_s9 }
  0x22   : > { %p55_p7 = scmp.eq.s32.totalorder %s2446_s10, 0  ;;  %s1819_s16 = sshll.u32 %s2438_s8, 3 }
  0x23   : > { %s245_s14 = sshll.u32 %s3598_s3, 4  ;;  %s3748_s12 = smov (%p36_p6, %s35_s12), 0  ;;  %s246_s14 = int_to_ptr.hbm [resolvable:$true] %s245_s14 }
  0x24   : > { %1992 = dma.hbm_to_vmem [thread:$0]  (!%p2578_p5), %s246_s14, 1024, %s248_s17, [#allocation9], %s3547_s19, %s3547_s19, %s3549_s20  }
  0x25   : > { %3602 = sst [smem:[#allocation26_spill]] %s3748_s12  ;;  %s3750_s13 = smov (!%p36_p6, %s38_s13), %s2442_s9 }
  0x26   : > { %s43_s3 = ssub.s32 %s2438_s8, %s3748_s12  ;;  %s1820_s6 = sadd.s32 4294967295, %s1819_s16 }
  0x27   : > { %p40_p8 = scmp.ge.s32.totalorder %s3750_s13, 2  ;;  %p72_p9 = scmp.gt.s32.totalorder %s1820_s6, 0 }
  0x28   : > { %s1821_s14 = sshll.u32 %s3748_s12, 3  ;;  %s83_s17 = sadd.s32 1, %s2414_s26 }
  0x29   : > { %s3752_s13 = smov (%p40_p8, %s3750_s13), 0  ;;  %s3754_s6 = smov (!%p72_p9, %s1820_s6), 0 }
  0x2a   : > { %3603 = sst [smem:[#allocation27_spill]] %s3752_s13  ;;  %s2602_s19 = ssub.s32 %s2442_s9, %s3752_s13 }
  0x2b   : > { %3604 = sst [smem:[#allocation28_spill]] %s2602_s19  ;;  %s1822_s20 = sadd.s32 4294967295, %s1821_s14 }
  0x2c   : > { %s2605_s7 = sor.u32 %s43_s3, %s2602_s19  ;;  %p76_p10 = scmp.gt.s32.totalorder %s1822_s20, 0 }
  0x2d   : > { %p45_p11 = scmp.eq.s32.totalorder %s2605_s7, 0  ;;  %p90_p12 = scmp.ne.s32.totalorder %s2414_s26, %s2410_s25 }
  0x2e   : > { %s3756_s20 = smov (!%p76_p10, %s1822_s20), 0  ;;  %p96_p0 = scmp.ne.s32.totalorder %s2410_s25, %s2406_s24 }
  0x2f   : > { %p2612_p13 = por %p90_p12, %p55_p7  ;;  %s79_s13 = ssub.s32 %s3754_s6, %s3756_s20 }
  0x30   : > { %s2618_s5 = sadd.s32 8, %s1819_s16  ;;  %s80_s3 = sor.u32 %s79_s13, %s2602_s19 }
  0x31   : > { %p2623_p2 = por %p96_p0, %p61_p1  ;;  %p81_p4 = scmp.eq.s32.totalorder %s80_s3, 0 }
  0x32   : > { %p108_p6 = scmp.lt.s32.totalorder %s2618_s5, 15  ;;  %s2628_s15 = sadd.s32 8, %s1821_s14 }
  0x33   : > { %s3606_s30 = scalar_select %p2623_p2, 1, 0 }
  0x34   : > { %p3563_p8 = scmp.lt.s32.totalorder %s2446_s10, 4  ;;  %s2636_s24 = sshll.u32 %s2442_s9, 5 }
  0x35   : > { %3607 = sst [smem:[#allocation29_spill]] %s3606_s30  ;;  %s303_s20 = sand.u32 1, %s2446_s10  }
  0x36   : > { %s2632_s2 = scalar_select %p81_p4, %s2414_s26, %s83_s17  }
  0x37   : > { %s305_s13 = sand.u32 1, %s2414_s26   ;;  %s1837_s25 = sshll.u32 %s3754_s6, 1 }
  0x38   : > { %3608 = sst [smem:[#allocation30_spill]] %s2632_s2  ;;  %s1834_s16 = sshll.u32 %s305_s13, 3 }
  0x39   : > { %s316_s0 = sadd.s32 %s1837_s25, %s2636_s24  ;;  %s307_s30 = scalar_lea.vmem [#allocation5], %s1834_s16 }
  0x3a   : > { %s321_s3 = sshll.u32 %s307_s30, 4  ;;  %s1839_s19 = sshll.u32 %s316_s0, 2  ;;  %s322_s3 = int_to_ptr.vmem [resolvable:$true] %s321_s3 }
  0x3b   : > { %s3609_s1 = sld [smem:[#allocation75_spill]]  ;;  %p2000_p10 = pnand %p3563_p8, %p2612_p13 }
  0x3c   : > { %s3610_s4 = sld [smem:[#allocation78_spill]]  ;;  %s2651_s30 = scalar_lea.sflag [#allocation6], %s303_s20 }
  0x3d   : > { %s3611_s21 = smov 4   ;;  %s2451_s12 = smov [#allocation10]  }
  0x3e   : > { %s261_s16 = sshll.u32 %s2451_s12, 4  ;;  %s2452_s14 = smov 128   ;;  %s262_s16 = int_to_ptr.vmem [resolvable:$true] %s261_s16 }
  0x3f   : > { %s1818_s20 = sadd.s32 4294967294, %s2446_s10   ;;  %s47_s25 = sadd.s32 1, %s2426_s29 }
  0x40   : > { %s2664_s13 = scalar_select %p45_p11, %s2426_s29, %s47_s25  }
  0x41   : > { %s318_s17 = scalar_lea.hbm %s3609_s1, %s1839_s19  ;;  %s3612_s19 = smov 64  }
  0x42   : > { %s319_s6 = sshll.u32 %s318_s17, 4  ;;  %s259_s0 = sshll.u32 %s3610_s4, 4  ;;  %s320_s6 = int_to_ptr.hbm [resolvable:$true] %s319_s6  ;;  %s260_s0 = int_to_ptr.hbm [resolvable:$true] %s259_s0 }
  0x43   : > { %2002 = dma.hbm_to_vmem [thread:$0]  (!%p2000_p10), %s320_s6, 128, %s322_s3, %s2651_s30, %s3612_s19, %s3612_s19, %s3611_s21  }
  0x44   : > { %s2453_s17 = smov 8   ;;  %3613 = sst [smem:[#allocation31_spill]] %s2664_s13 }
  0x45   : > { %1995 = dma.hbm_to_vmem [thread:$0]  (!%p2578_p5), %s260_s0, 256, %s262_s16, [#allocation9], %s2452_s14, %s2452_s14, %s2453_s17  }
  0x46   : > { %p54_p12 = scmp.ne.s32.totalorder %s2426_s29, %s2422_s28  ;;  %p60_p13 = scmp.ne.s32.totalorder %s2422_s28, %s2418_s27 }
  0x47   : > { %p221_p0 = scmp.eq.s32.totalorder %s2562_s11, 3  ;;  %p227_p4 = scmp.eq.s32.totalorder %s1818_s20, 3 }
  0x48   : > { %p2673_p10 = por %p55_p7, %p54_p12  ;;  %p2679_p9 = por %p61_p1, %p60_p13 }
  0x49   : > { %p2683_p5 = por %p221_p0, %p54_p12  ;;  %p2687_p11 = por %p227_p4, %p60_p13 }
  0x4a   : > { %s278_s0 = sand.u32 1, %s2426_s29   ;;  %s1923_s12 = sshll.u32 %s2438_s8, 4 }
  0x4b   : > { %s1829_s16 = sshll.u32 %s278_s0, 6  ;;  %s288_s14 = sadd.s32 %s1923_s12, %s2636_s24 }
  0x4c   : > { %s3618_s17 = sld [smem:[#allocation17_spill]]  ;;  %s1833_s20 = sshll.u32 %s288_s14, 2 }
  0x4d   : > { %s3619_s25 = sld [smem:[#allocation28_spill]]  ;;  %s282_s1 = scalar_lea.vmem [#allocation2], %s1829_s16 }
  0x4e   : > { %s293_s4 = sshll.u32 %s282_s1, 4  ;;  %s3620_s2 = sld [smem:[#allocation74_spill]]  ;;  %s294_s4 = int_to_ptr.vmem [resolvable:$true] %s293_s4 }
  0x4f   : > { %p1997_p12 = pnand %p3563_p8, %p2673_p10  ;;  %s279_s12 = scalar_lea.sflag [#allocation3], %s278_s0 }
  0x50   : > { %s3758_s5 = smov (!%p108_p6, %s2618_s5), 15  ;;  %p3621_p13 = scmp.lt.s32.totalorder %s2628_s15, 15 }
  0x51   : > { %s119_s1 = sadd.s32 1, %s2402_s23  ;;  %p126_p0 = scmp.ne.s32.totalorder %s2402_s23, %s2398_s22 }
  0x52   : > { %s3760_s15 = smov (!%p3621_p13, %s2628_s15), 15  ;;  %p132_p4 = scmp.ne.s32.totalorder %s2398_s22, %s3618_s17 }
  0x53   : > { %p2718_p10 = por %p126_p0, %p55_p7  ;;  %s1842_s13 = sshll.u32 %s3758_s5, 1 }
  0x54   : > { %s290_s26 = scalar_lea.hbm %s3620_s2, %s1833_s20  ;;  %s115_s2 = ssub.s32 %s3758_s5, %s3760_s15 }
  0x55   : > { %s291_s29 = sshll.u32 %s290_s26, 4  ;;  %s116_s26 = sor.u32 %s115_s2, %s3619_s25  ;;  %s292_s29 = int_to_ptr.hbm [resolvable:$true] %s291_s29 }
  0x56   : > { %1999 = dma.hbm_to_vmem [thread:$0]  (!%p1997_p12), %s292_s29, 1024, %s294_s4, %s279_s12, %s3612_s19, %s3612_s19, %s3611_s21  }
  0x57   : > { %p117_p8 = scmp.eq.s32.totalorder %s116_s26, 0  ;;  %p2724_p12 = por %p132_p4, %p61_p1 }
  0x58   : > { %s333_s29 = sand.u32 1, %s2402_s23   ;;  %s344_s0 = sadd.s32 %s1842_s13, %s2636_s24 }
  0x59   : > { %s2730_s3 = scalar_select %p117_p8, %s2402_s23, %s119_s1  }
  0x5a   : > { %s1840_s15 = sshll.u32 %s333_s29, 3  ;;  %s1844_s16 = sshll.u32 %s344_s0, 2 }
  0x5b   : > { %s3624_s20 = sld [smem:[#allocation76_spill]]  ;;  %s335_s12 = scalar_lea.vmem [#allocation7], %s1840_s15 }
  0x5c   : > { %s349_s2 = sshll.u32 %s335_s12, 4  ;;  %p3625_p7 = scmp.lt.s32.totalorder %s2446_s10, 4  ;;  %s350_s2 = int_to_ptr.vmem [resolvable:$true] %s349_s2 }
  0x5e   : > { %p2003_p6 = pnand %p3625_p7, %p2718_p10 }
  0x5f   : > { %361 = sbr.rel (%p2570_p3) target bundleno = 492 (0x1ec), region = 44 }
  0x61   : > { %s346_s25 = scalar_lea.hbm %s3624_s20, %s1844_s16 }
  0x62   : > { %s347_s8 = sshll.u32 %s346_s25, 4  ;;  %s348_s8 = int_to_ptr.hbm [resolvable:$true] %s347_s8 }
  0x63   : > { %2005 = dma.hbm_to_vmem [thread:$0]  (!%p2003_p6), %s348_s8, 128, %s350_s2, %s2651_s30, %s3612_s19, %s3612_s19, %s3611_s21  }
  0x64   : > { %s2747_s24 = sand.u32 1, %s2422_s28  }
  0x65   : > { %s1846_s1 = sshll.u32 %s2747_s24, 6  ;;  %s364_s26 = scalar_lea.sflag [#allocation3], %s2747_s24 }
  0x66   : > { %s2751_s29 = scalar_lea.vmem [#allocation2], %s1846_s1 }
  0x67   : > { %2373 = dma.done.wait (%p2679_p9), %s364_s26, 1024  }
  0x68   : > { %2375 = vsyncadd (%p2679_p9), %s364_s26, 4294966272  ;;  %s3627_s8 = sld [smem:[#allocation18_spill]]  ;;  %s373_s21 = sand.u32 1, %s2562_s11  }
  0x69   : > { %s374_s13 = scalar_lea.sflag [#allocation6], %s373_s21 }
  0x6e   : > { %s375_s19 = sand.u32 1, %s3627_s8  }
  0x6f   : > { %s2759_s9 = sshll.u32 %s375_s19, 3 }
  0x70   : > { %s377_s15 = scalar_lea.vmem [#allocation5], %s2759_s9 }
  0x71   : > { %2377 = dma.done.wait (%p2623_p2), %s374_s13, 128  }
  0x72   : > { %2379 = vsyncadd (%p2623_p2), %s374_s13, 4294967168  ;;  %s385_s0 = sand.u32 1, %s2398_s22  }
  0x73   : > { %s2767_s18 = sshll.u32 %s385_s0, 3 }
  0x74   : > { %s387_s16 = scalar_lea.vmem [#allocation7], %s2767_s18 }
  0x75   : > { %2381 = dma.done.wait (%p2724_p12), %s374_s13, 128  }
  0x76   : > { %2383 = vsyncadd (%p2724_p12), %s374_s13, 4294967168 }
  0x77   : > { %2385 = dma.done.wait (%p61_p1), [#allocation9], 1280  }
  0x78   : > { %2387 = vsyncadd (%p61_p1), [#allocation9], 4294966016  ;;  %s3629_s14 = sld [smem:[#allocation21_spill]]  ;;  %v1939_v0 = vld [vmem:[#allocation8 + $0x38] sm:$0xff]  ;;  %v1938_v1 = vld [vmem:[#allocation8 + $0x30] sm:$0xff]  ;;  %vm849_vm0 = vcmask 1040384  }
  0x79   : > { %640 = vmatpush.bf16.msra.mxu0 %v1939_v0  ;;  %1949 = vmatpush.bf16.msra.mxu1 %v1939_v0  ;;  %v1937_v2 = vld [vmem:[#allocation8 + $0x28] sm:$0xff]  ;;  %v1936_v3 = vld [vmem:[#allocation8 + $0x20] sm:$0xff]  ;;  %v1935_v9 = vld [vmem:[#allocation8 + $0x18] sm:$0xff]  ;;  %vm850_vm1 = vsmask.f32 256  ;;  %vm892_vm2 = vcmask 1047552  }
  0x7a   : > { %1950 = vmatpush.bf16.msra.mxu2 %v1939_v0  ;;  %1951 = vmatpush.bf16.msra.mxu3 %v1939_v0  ;;  %v1942_v4 = vld [vmem:[%s377_s15] sm:$0xff]   ;;  %v1934_v12 = vld [vmem:[#allocation8 + $0x10] sm:$0xff]  ;;  %v1927_v21 = vld [vmem:[%s2751_s29 + $0x18] sm:$0xff]  ;;  %vm893_vm3 = vsmask.f32 7424 }
  0x7b   : > { %v1943_v6 = vunpack.c.l.bf16 %v1942_v4  ;;  %v1944_v7 = vunpack.c.h.bf16 %v1942_v4  ;;  %v1933_v15 = vld [vmem:[#allocation8 + $0x8] sm:$0xff]  ;;  %v1932_v18 = vld [vmem:[#allocation8] sm:$0xff]  ;;  %v1930_v22 = vld [vmem:[%s2751_s29 + $0x30] sm:$0xff] }
  0x7c   : > { %v1925_v20 = vld [vmem:[%s2751_s29 + $0x8] sm:$0xff]  ;;  %v1946_v23 = vld [vmem:[%s387_s16] sm:$0xff]   ;;  %v1924_v25 = vld [vmem:[%s2751_s29] sm:$0xff]  ;;  %s3641_s16 = sld [smem:[#allocation79_spill]] }
  0x7d   : > { %641 = vmatpush.bf16.msra.mxu0 %v1938_v1  ;;  %1952 = vmatpush.bf16.msra.mxu1 %v1938_v1  ;;  %v1926_v26 = vld [vmem:[%s2751_s29 + $0x10] sm:$0xff]  ;;  %v1928_v27 = vld [vmem:[%s2751_s29 + $0x20] sm:$0xff]  ;;  %v1931_v28 = vld [vmem:[%s2751_s29 + $0x38] sm:$0xff]  ;;  %v1947_v29 = vunpack.c.l.bf16 %v1946_v23  ;;  %v1948_v30 = vunpack.c.h.bf16 %v1946_v23 }
  0x7e   : > { %p448_p3 = scmp.gt.s32.totalorder %s3629_s14, 0  ;;  %p461_p8 = scmp.lt.s32.totalorder %s3629_s14, 1  ;;  %1953 = vmatpush.bf16.msra.mxu2 %v1938_v1  ;;  %1954 = vmatpush.bf16.msra.mxu3 %v1938_v1  ;;  %v1929_v38 = vld [vmem:[%s2751_s29 + $0x28] sm:$0xff]  ;;  %v996_v40 = vld [vmem:[#allocation10 + $0x1] sm:$0x1]  ;;  %vm2853_vm4 = vmand %vm849_vm0, %vm850_vm1 }
  0x7f   : > { %v1243_v41 = vld [vmem:[#allocation10 + $0x4] sm:$0x1]  ;;  %v997_v42 = vpack.c.bf16 %v996_v40, %v996_v40  ;;  %v1462_v43 = vld [vmem:[#allocation10 + $0x7] sm:$0x1]  ;;  %v909_v45 = vld [vmem:[#allocation10] sm:$0x1] }
  0x80   : > { %s449_s17 = scalar_select %p448_p3, 1, 0  ;;  %v1244_v44 = vpack.c.bf16 %v1243_v41, %v1243_v41  ;;  %v1083_v46 = vld [vmem:[#allocation10 + $0x2] sm:$0x1]  ;;  %v1463_v47 = vpack.c.bf16 %v1462_v43, %v1462_v43  ;;  %v910_v49 = vpack.c.bf16 %v909_v45, %v909_v45  ;;  %v1170_v52 = vld [vmem:[#allocation10 + $0x3] sm:$0x1]  ;;  %vm2863_vm5 = vmand %vm892_vm2, %vm893_vm3 }
  0x81   : > { %s462_s5 = scalar_select %p461_p8, 1, 0  ;;  %642 = vmatpush.bf16.msra.mxu0 %v1937_v2  ;;  %1955 = vmatpush.bf16.msra.mxu1 %v1937_v2  ;;  %v999_v48 = vpack.i.b16 %v997_v42, %v997_v42  ;;  %v1084_v51 = vpack.c.bf16 %v1083_v46, %v1083_v46  ;;  %v1316_v53 = vld [vmem:[#allocation10 + $0x5] sm:$0x1]  ;;  %v1389_v55 = vld [vmem:[#allocation10 + $0x6] sm:$0x1]  ;;  %v1171_v63 = vpack.c.bf16 %v1170_v52, %v1170_v52 }
  0x82   : > { %s450_s20 = scvt.s32.f32 %s449_s17  ;;  %1956 = vmatpush.bf16.msra.mxu2 %v1937_v2  ;;  %1957 = vmatpush.bf16.msra.mxu3 %v1937_v2  ;;  %v1246_v50 = vpack.i.b16 %v1244_v44, %v1244_v44  ;;  %v1465_v54 = vpack.i.b16 %v1463_v47, %v1463_v47  ;;  %v1535_v56 = vld [vmem:[#allocation10 + $0x8] sm:$0x1]  ;;  %v912_v58 = vpack.i.b16 %v910_v49, %v910_v49 }
  0x83   : > { %s2782_s30 = scvt.s32.f32 %s462_s5  ;;  %v1001_v57 = vperm.slane %v999_v48, 0  ;;  %v1086_v62 = vpack.i.b16 %v1084_v51, %v1084_v51  ;;  %v1317_v0 = vpack.c.bf16 %v1316_v53, %v1316_v53  ;;  %v1536_v4 = vpack.c.bf16 %v1535_v56, %v1535_v56  ;;  %s1940_s5 = sshll.u32 %s3629_s14, 4 }
  0x84   : > { %s453_s25 = sshrl.u32 %s450_s20, 16  ;;  %p452_p2 = scmp.ne.f32.partialorder %s450_s20, %s450_s20  ;;  %v1248_v61 = vperm.slane %v1246_v50, 0 }
  0x85   : > { %s454_s12 = sand.u32 1, %s453_s25  ;;  %643 = vmatpush.bf16.msra.mxu0 %v1936_v3  ;;  %1958 = vmatpush.bf16.msra.mxu1 %v1936_v3  ;;  %s466_s21 = sshrl.u32 %s2782_s30, 16 }
  0x86   : > { %s455_s2 = sadd.s32 32767, %s454_s12  ;;  %1959 = vmatpush.bf16.msra.mxu2 %v1936_v3  ;;  %1960 = vmatpush.bf16.msra.mxu3 %v1936_v3  ;;  %s467_s19 = sand.u32 1, %s466_s21  ;;  %v1390_v3 = vpack.c.bf16 %v1389_v55, %v1389_v55 }
  0x87   : > { %s456_s4 = sadd.s32 %s455_s2, %s450_s20  ;;  %s468_s9 = sadd.s32 32767, %s467_s19 }
  0x88   : > { %s457_s11 = sand.u32 4294901760, %s456_s4  ;;  %s469_s13 = sadd.s32 %s468_s9, %s2782_s30 }
  0x89   : > { %s3762_s11 = smov (%p452_p2, %s457_s11), 2143289344  ;;  %644 = vmatpush.bf16.msra.mxu0 %v1935_v9  ;;  %1961 = vmatpush.bf16.msra.mxu1 %v1935_v9  ;;  %p465_p1 = scmp.ne.f32.partialorder %s2782_s30, %s2782_s30 }
  0x8a   : > { %s460_s1 = sshrl.u32 %s3762_s11, 16  ;;  %1962 = vmatpush.bf16.msra.mxu2 %v1935_v9  ;;  %1963 = vmatpush.bf16.msra.mxu3 %v1935_v9  ;;  %s470_s15 = sand.u32 4294901760, %s469_s13  ;;  %v2801_v9 = vunpack.c.l.bf16 %v1001_v57 }
  0x8b   : > { %s476_s26 = sshll.u32 %s460_s1, 16  ;;  %s3764_s15 = smov (%p465_p1, %s470_s15), 2143289344 }
  0x8c   : > { %s477_s8 = sor.u32 %s476_s26, %s460_s1  ;;  %s473_s0 = sshrl.u32 %s3764_s15, 16  ;;  %3630 = vst [vmem:[#allocation32_spill] sm:$0xff] %v2801_v9 }
  0x8d   : > { %v478_v5 = vstv %s477_s8  ;;  %645 = vmatpush.bf16.msra.mxu0 %v1934_v12  ;;  %1964 = vmatpush.bf16.msra.mxu1 %v1934_v12  ;;  %s489_s17 = sshll.u32 %s473_s0, 16  ;;  %s1851_s25 = sshll.u32 %s2747_s24, 7 }
  0x8e   : > { %v482_v8 = vunpack.c.l.bf16 %v478_v5  ;;  %1965 = vmatpush.bf16.msra.mxu2 %v1934_v12  ;;  %1966 = vmatpush.bf16.msra.mxu3 %v1934_v12  ;;  %s490_s20 = sor.u32 %s489_s17, %s473_s0  ;;  %v1467_v5 = vperm.slane %v1465_v54, 0  ;;  %v2803_v12 = vunpack.c.l.bf16 %v1248_v61  ;;  %s3204_s12 = scalar_lea.vmem [#allocation11], %s1851_s25 }
  0x8f   : > { %v491_v24 = vstv %s490_s20  ;;  %s3720_s11 = sld [smem:[#allocation22_spill]]  ;;  %s1656_s13 = sshll.u32 %s3204_s12, 4  ;;  %s1657_s13 = int_to_ptr.vmem [resolvable:$true] %s1656_s13 }
  0x90   : > { %v483_v10 = vmul.f32 %v1943_v6, %v482_v8  ;;  %v484_v11 = vmul.f32 %v1944_v7, %v482_v8  ;;  %v495_v31 = vunpack.c.l.bf16 %v491_v24  ;;  %v914_v8 = vperm.slane %v912_v58, 0  ;;  %3631 = vst [vmem:[#allocation33_spill] sm:$0xff] %v2803_v12  ;;  %s3729_s21 = sld [smem:[#allocation80_spill]]  ;;  %s1641_s0 = scalar_lea.sflag [#allocation4], %s2747_s24 }
  0x91   : > { %646 = vmatpush.bf16.msra.mxu0 %v1933_v15  ;;  %1967 = vmatpush.bf16.msra.mxu1 %v1933_v15 }
  0x92   : > { %v485_v13 = vpack.c.bf16 %v483_v10, %v483_v10  ;;  %v486_v14 = vpack.c.bf16 %v484_v11, %v484_v11  ;;  %1968 = vmatpush.bf16.msra.mxu2 %v1933_v15  ;;  %1969 = vmatpush.bf16.msra.mxu3 %v1933_v15  ;;  %v496_v32 = vmul.f32 %v1947_v29, %v495_v31 }
  0x93   : > { %v497_v33 = vmul.f32 %v1948_v30, %v495_v31  ;;  %v1173_v10 = vpack.i.b16 %v1171_v63, %v1171_v63  ;;  %v1319_v11 = vpack.i.b16 %v1317_v0, %v1317_v0  ;;  %v1538_v15 = vpack.i.b16 %v1536_v4, %v1536_v4 }
  0x94   : > { %v552_v16 = vunpack.c.l.b16 %v485_v13  ;;  %v553_v17 = vunpack.c.l.b16 %v486_v14  ;;  %v498_v34 = vpack.c.bf16 %v496_v32, %v496_v32  ;;  %v1088_v13 = vperm.slane %v1086_v62, 0 }
  0x95   : > { %647 = vmatpush.bf16.msra.mxu0 %v1932_v18  ;;  %1970 = vmatpush.bf16.msra.mxu1 %v1932_v18  ;;  %v499_v35 = vpack.c.bf16 %v497_v33, %v497_v33  ;;  %v1392_v14 = vpack.i.b16 %v1390_v3, %v1390_v3  ;;  %v1540_v31 = vperm.slane %v1538_v15, 0  ;;  %s1919_s1 = sshll.u32 %s3720_s11, 5 }
  0x96   : > { %v572_v19 = vpack.c.b16 %v553_v17, %v552_v16  ;;  %1971 = vmatpush.bf16.msra.mxu2 %v1932_v18  ;;  %1972 = vmatpush.bf16.msra.mxu3 %v1932_v18  ;;  %v570_v36 = vunpack.c.l.b16 %v498_v34  ;;  %v2806_v17 = vunpack.c.l.bf16 %v1467_v5  ;;  %v2817_v29 = vunpack.c.l.bf16 %v1088_v13  ;;  %s3445_s14 = sadd.s32 %s1940_s5, %s1919_s1  ;;  %s3730_s19 = smov %s3729_s21 }
  0x97   : > { %v571_v37 = vunpack.c.l.b16 %v499_v35  ;;  %v1394_v30 = vperm.slane %v1392_v14, 0  ;;  %v2830_v48 = vunpack.c.l.bf16 %v1540_v31  ;;  %s1920_s26 = sshll.u32 %s3445_s14, 3  ;;  %s2308_s25 = scalar_lea.hbm %s3730_s19, 512 }
  0x98   : > { %648 = vmatmul.bf16.vlgmr.msra.gmra.mxu0 %v572_v19  ;;  %658 = vmatmul.bf16.vlgmr.msra.gmra.mxu1 %v1925_v20  ;;  %s1655_s9 = scalar_lea.hbm %s3729_s21, %s1920_s26 }
  0x99   : > { %668 = vmatmul.bf16.vlgmr.msra.gmra.mxu2 %v1927_v21  ;;  %683 = vmatmul.bf16.vlgmr.msra.gmra.mxu3 %v1930_v22  ;;  %v581_v39 = vpack.c.b16 %v571_v37, %v570_v36  ;;  %v2810_v21 = vunpack.c.l.bf16 %v914_v8  ;;  %v2828_v47 = vunpack.c.l.bf16 %v1394_v30  ;;  %3632 = vst [vmem:[#allocation34_spill] sm:$0xff] %v2830_v48  ;;  %s1658_s15 = sshll.u32 %s1655_s9, 4  ;;  %s1659_s15 = int_to_ptr.hbm [resolvable:$true] %s1658_s15 }
  0x9a   : > { %s2302_s17 = sshra.s32 %s1659_s15, 4  ;;  %s2303_s17 = int_to_ptr.hbm [resolvable:$true] %s2302_s17 }
  0x9b   : > { %s2304_s20 = scalar_lea.hbm %s2303_s17, 128  ;;  %p2309_p4 = scmp.lt.s32.totalorder %s2303_s17, %s3730_s19 }
  0x9c   : > { %p2305_p9 = scmp.ne.s32.totalorder %s2303_s17, %s2304_s20  ;;  %p2310_p10 = scmp.lt.s32.totalorder %s2308_s25, %s2304_s20 }
  0x9e   : > { %p2306_p13 = pnand %p2305_p9, %p2683_p5  ;;  %p2311_p12 = por %p2310_p10, %p2309_p4 }
  0xa0   : > { %p2307_p0 = pneg %p2306_p13 }
  0xa2   : > { %p2312_p7 = pnand %p2311_p12, %p2307_p0 }
  0xa8   : > { %653 = vmatmul.bf16.gmra.mxu0 %v1924_v25  ;;  %663 = vmatmul.bf16.gmra.mxu1 %v1926_v26  ;;  %v1175_v26 = vperm.slane %v1173_v10, 0 }
  0xa9   : > { %673 = vmatmul.bf16.gmra.mxu2 %v1928_v27  ;;  %688 = vmatmul.bf16.gmra.mxu3 %v1931_v28  ;;  %v1321_v27 = vperm.slane %v1319_v11, 0 }
  0xaa   : > { %v2823_v43 = vunpack.c.l.bf16 %v1175_v26 }
  0xab   : > { %v2825_v44 = vunpack.c.l.bf16 %v1321_v27 }
  0xb9   : > { %678 = vmatmul.bf16.gmra.mxu2 %v1929_v38  ;;  %693 = vmatmul.bf16.gmra.mxu3 %v581_v39 }
 0x115   : > { %v649_v59 = vpop.f32.mrf.mxu0  ;;  %v659_v60 = vpop.f32.mrf.mxu1 }
 0x116   : > { %v699_v1 = vpack.c.bf16 %v649_v59, %v649_v59  ;;  %v2798_v2 = vpack.c.bf16 %v659_v60, %v659_v60 }
 0x118   : > { %v1003_v6 = vunpack.c.l.bf16 %v699_v1  ;;  %v1007_v7 = vunpack.c.l.bf16 %v2798_v2  ;;  %v739_v32 = vunpack.c.l.b16 %v699_v1  ;;  %v743_v34 = vunpack.c.l.b16 %v2798_v2 }
 0x11a   : > { %v1019_v16 = vmul.f32 %v1003_v6, %v2801_v9  ;;  %v1023_v18 = vmul.f32 %v1007_v7, %v2801_v9  ;;  %v1254_v19 = vmul.f32 %v2803_v12, %v1007_v7  ;;  %v1471_v22 = vmul.f32 %v2806_v17, %v1007_v7 }
 0x11c   : > { %v669_v20 = vpop.f32.mrf.mxu2  ;;  %v684_v24 = vpop.f32.mrf.mxu3  ;;  %v1035_v33 = vpack.c.bf16 %v1019_v16, %v1019_v16  ;;  %v1039_v36 = vpack.c.bf16 %v1023_v18, %v1023_v18  ;;  %v1270_v37 = vpack.c.bf16 %v1254_v19, %v1254_v19  ;;  %v1487_v41 = vpack.c.bf16 %v1471_v22, %v1471_v22 }
 0x11d   : > { %v2813_v23 = vpack.c.bf16 %v669_v20, %v669_v20  ;;  %v651_v25 = vpop.f32.mrf.mxu0  ;;  %v2815_v28 = vpack.c.bf16 %v684_v24, %v684_v24  ;;  %v661_v40 = vpop.f32.mrf.mxu1 }
 0x11e   : > { %v700_v39 = vpack.c.bf16 %v651_v25, %v651_v25  ;;  %v2832_v49 = vunpack.c.l.bf16 %v1035_v33  ;;  %v704_v52 = vpack.c.bf16 %v661_v40, %v661_v40  ;;  %v2835_v53 = vunpack.c.l.bf16 %v1039_v36 }
 0x11f   : > { %v1011_v35 = vunpack.c.l.bf16 %v2813_v23  ;;  %v1017_v38 = vunpack.c.l.bf16 %v2815_v28  ;;  %v2837_v54 = vunpack.c.l.bf16 %v1270_v37  ;;  %v2840_v58 = vunpack.c.l.bf16 %v1487_v41 }
 0x120   : > { %v740_v46 = vunpack.c.l.b16 %v700_v39  ;;  %v1004_v51 = vunpack.c.l.bf16 %v700_v39  ;;  %v747_v62 = vunpack.c.l.b16 %v2813_v23  ;;  %v744_v4 = vunpack.c.l.b16 %v704_v52 }
 0x121   : > { %v1027_v42 = vmul.f32 %v1011_v35, %v2801_v9  ;;  %v1258_v45 = vmul.f32 %v2803_v12, %v1011_v35  ;;  %v1475_v50 = vmul.f32 %v2806_v17, %v1011_v35  ;;  %v1033_v55 = vmul.f32 %v1017_v38, %v2801_v9 }
 0x122   : > { %v759_v56 = vpack.c.b16 %v740_v46, %v739_v32  ;;  %v1264_v60 = vmul.f32 %v2803_v12, %v1017_v38  ;;  %v2844_v61 = vmul.f32 %v2806_v17, %v1017_v38  ;;  %v1020_v3 = vmul.f32 %v1004_v51, %v2801_v9 }
 0x123   : > { %v1043_v59 = vpack.c.bf16 %v1027_v42, %v1027_v42  ;;  %v1274_v63 = vpack.c.bf16 %v1258_v45, %v1258_v45  ;;  %v1491_v2 = vpack.c.bf16 %v1475_v50, %v1475_v50  ;;  %v753_v6 = vunpack.c.l.b16 %v2815_v28 }
 0x124   : > { %v671_v57 = vpop.f32.mrf.mxu2  ;;  %v770_v0 = vshrl.u32 %v759_v56, 16  ;;  %v773_v1 = vshll.u32 %v759_v56, 16  ;;  %v1049_v7 = vpack.c.bf16 %v1033_v55, %v1033_v55  ;;  %v1280_v14 = vpack.c.bf16 %v1264_v60, %v1264_v60 }
 0x125   : > { %v2848_v5 = vpack.c.bf16 %v671_v57, %v671_v57  ;;  %v2857_v13 = vunpack.c.l.bf16 %v1043_v59  ;;  %v1497_v15 = vpack.c.bf16 %v2844_v61, %v2844_v61  ;;  %v761_v18 = vpack.c.b16 %v744_v4, %v743_v34  ;;  %v2890_v57 = vld [vmem:[%s3641_s16] ss:$0 sm:$0xff] }
 0x126   : > { %v772_v8 = vrot.slane %v770_v0, 7  ;;  %v862_v11 = vrot.slane %v773_v1, 1  ;;  %v2867_v19 = vunpack.c.l.bf16 %v1274_v63  ;;  %v2870_v24 = vunpack.c.l.bf16 %v1491_v2 }
 0x127   : > { %v748_v23 = vunpack.c.l.b16 %v2848_v5  ;;  %v1036_v25 = vpack.c.bf16 %v1020_v3, %v1020_v3  ;;  %v784_v26 = vshrl.u32 %v761_v18, 16  ;;  %v1008_v27 = vunpack.c.l.bf16 %v704_v52 }
 0x128   : > { %3637 = vst [vmem:[#allocation35_spill] sm:$0xff] %v2867_v19  ;;  %v775_v20 = vor.u32 %v773_v1, %v772_v8  ;;  %v863_v22 = vor.u32 %v862_v11, %v770_v0  ;;  %v787_v32 = vshll.u32 %v761_v18, 16  ;;  %v2878_v38 = vunpack.c.l.bf16 %v1049_v7 }
 0x129   : > { %3638 = vst [vmem:[#allocation36_spill] sm:$0xff] %v2870_v24  ;;  %v2876_v33 = vpack.c.b16 %v748_v23, %v747_v62  ;;  %v2880_v39 = vunpack.c.l.bf16 %v1280_v14  ;;  %v786_v40 = vrot.slane %v784_v26, 7  ;;  %v1052_v51 = vunpack.c.l.bf16 %v1036_v25 }
 0x12a   : > { %v852_v30 = vsel %vm2853_vm4, 0, %v775_v20  ;;  %v895_v31 = vsel %vm2863_vm5, %v863_v22, 0  ;;  %3639 = vst [vmem:[#allocation37_spill] sm:$0xff] %v2878_v38  ;;  %v866_v41 = vrot.slane %v787_v32, 1  ;;  %v1024_v62 = vmul.f32 %v1008_v27, %v2801_v9 }
 0x12b   : > { %v916_v34 = vunpack.c.l.bf16 %v852_v30  ;;  %v917_v35 = vunpack.c.h.bf16 %v852_v30  ;;  %v1090_v36 = vunpack.c.l.bf16 %v895_v31  ;;  %v1091_v37 = vunpack.c.h.bf16 %v895_v31  ;;  %3640 = vst [vmem:[#allocation38_spill] sm:$0xff] %v2880_v39 }
 0x12c   : > { %v789_v52 = vor.u32 %v787_v32, %v786_v40  ;;  %v867_v55 = vor.u32 %v866_v41, %v784_v26  ;;  %v798_v56 = vshrl.u32 %v2876_v33, 16  ;;  %v1255_v63 = vmul.f32 %v2803_v12, %v1008_v27  ;;  %v686_v41 = vpop.f32.mrf.mxu3 }
 0x12d   : > { %v932_v42 = vmul.f32 %v916_v34, %v2810_v21  ;;  %v933_v45 = vmul.f32 %v917_v35, %v2810_v21  ;;  %v1106_v46 = vmul.f32 %v1090_v36, %v2817_v29  ;;  %v1107_v50 = vmul.f32 %v1091_v37, %v2817_v29 }
 0x12e   : > { %v854_v1 = vsel %vm2853_vm4, 0, %v789_v52  ;;  %v897_v2 = vsel %vm2863_vm5, %v867_v55, 0  ;;  %v1472_v3 = vmul.f32 %v2806_v17, %v1008_v27  ;;  %v800_v11 = vrot.slane %v798_v56, 7 }
 0x12f   : > { %v948_v59 = vpack.c.bf16 %v932_v42, %v932_v42  ;;  %v949_v60 = vpack.c.bf16 %v933_v45, %v933_v45  ;;  %v1122_v0 = vpack.c.bf16 %v1106_v46, %v1106_v46  ;;  %v1123_v8 = vpack.c.bf16 %v1107_v50, %v1107_v50 }
 0x130   : > { %v920_v14 = vunpack.c.l.bf16 %v854_v1  ;;  %v2899_v18 = vunpack.c.h.bf16 %v854_v1  ;;  %v1094_v20 = vunpack.c.l.bf16 %v897_v2  ;;  %v2901_v22 = vunpack.c.h.bf16 %v897_v2 }
 0x131   : > { %v964_v4 = vunpack.c.l.bf16 %v948_v59  ;;  %v965_v7 = vunpack.c.l.bf16 %v949_v60  ;;  %v1040_v26 = vpack.c.bf16 %v1024_v62, %v1024_v62  ;;  %v801_v30 = vshll.u32 %v2876_v33, 16 }
 0x132   : > { %v936_v31 = vmul.f32 %v920_v14, %v2810_v21  ;;  %v937_v27 = vmul.f32 %v2899_v18, %v2810_v21  ;;  %v1110_v32 = vmul.f32 %v1094_v20, %v2817_v29  ;;  %v1111_v34 = vmul.f32 %v2901_v22, %v2817_v29 }
 0x133   : > { %v980_v23 = vadd.f32 %v2890_v57, %v964_v4  ;;  %v981_v25 = vadd.f32 %v2890_v57, %v965_v7  ;;  %v1138_v35 = vunpack.c.l.bf16 %v1122_v0  ;;  %v1139_v36 = vunpack.c.l.bf16 %v1123_v8 }
 0x134   : > { %v1271_v37 = vpack.c.bf16 %v1255_v63, %v1255_v63  ;;  %v1488_v40 = vpack.c.bf16 %v1472_v3, %v1472_v3  ;;  %v952_v45 = vpack.c.bf16 %v936_v31, %v936_v31  ;;  %v953_v46 = vpack.c.bf16 %v937_v27, %v937_v27  ;;  %v689_v38 = vpop.f32.mrf.mxu3 }
 0x135   : > { %v1067_v42 = vadd.f32 %v2832_v49, %v980_v23  ;;  %v803_v33 = vor.u32 %v801_v30, %v800_v11  ;;  %v1068_v50 = vadd.f32 %v1052_v51, %v981_v25  ;;  %v1126_v52 = vpack.c.bf16 %v1110_v32, %v1110_v32 }
 0x136   : > { %v1181_v55 = vmul.f32 %v2823_v43, %v920_v14  ;;  %v870_v59 = vrot.slane %v801_v30, 1  ;;  %v2917_v60 = vunpack.c.l.bf16 %v1497_v15  ;;  %v1127_v62 = vpack.c.bf16 %v1111_v34, %v1111_v34 }
 0x137   : > { %v1327_v63 = vmul.f32 %v2825_v44, %v1094_v20  ;;  %v2920_v0 = vpack.c.bf16 %v686_v41, %v686_v41  ;;  %v968_v1 = vunpack.c.l.bf16 %v952_v45  ;;  %v969_v49 = vunpack.c.l.bf16 %v953_v46 }
 0x138   : > { %3642 = vst [vmem:[#allocation39_spill] sm:$0xff] %v2917_v60  ;;  %v1056_v2 = vunpack.c.l.bf16 %v1040_v26  ;;  %v2922_v3 = vunpack.c.l.bf16 %v1271_v37  ;;  %v2924_v51 = vadd.f32 %v1138_v35, %v1067_v42  ;;  %v1398_v4 = vmul.f32 %v2828_v47, %v920_v14 }
 0x139   : > { %v2927_v7 = vunpack.c.l.bf16 %v1488_v40  ;;  %v856_v61 = vsel %vm2853_vm4, 0, %v803_v33  ;;  %v2931_v15 = vadd.f32 %v1139_v36, %v1068_v50  ;;  %v1142_v8 = vunpack.c.l.bf16 %v1126_v52 }
 0x13a   : > { %v1197_v11 = vpack.c.bf16 %v1181_v55, %v1181_v55  ;;  %v871_v23 = vor.u32 %v870_v59, %v798_v56  ;;  %v1143_v25 = vunpack.c.l.bf16 %v1127_v62  ;;  %v1343_v30 = vpack.c.bf16 %v1327_v63, %v1327_v63 }
 0x13b   : > { %v1544_v26 = vmul.f32 %v2830_v48, %v1094_v20  ;;  %v924_v31 = vunpack.c.l.bf16 %v856_v61  ;;  %v984_v27 = vadd.f32 %v2890_v57, %v968_v1  ;;  %v985_v32 = vadd.f32 %v2890_v57, %v969_v49 }
 0x13c   : > { %v899_v14 = vsel %vm2863_vm5, %v871_v23, 0  ;;  %v2938_v34 = vunpack.c.h.bf16 %v856_v61  ;;  %v1414_v35 = vpack.c.bf16 %v1398_v4, %v1398_v4  ;;  %v2942_v36 = vmul.f32 %v2830_v48, %v2901_v22 }
 0x13d   : > { %v940_v56 = vmul.f32 %v924_v31, %v2810_v21  ;;  %v1012_v37 = vunpack.c.l.bf16 %v2848_v5  ;;  %v1098_v40 = vunpack.c.l.bf16 %v899_v14  ;;  %v1099_v41 = vunpack.c.h.bf16 %v899_v14 }
 0x13e   : > { %v941_v20 = vmul.f32 %v2938_v34, %v2810_v21  ;;  %v1185_v42 = vmul.f32 %v2823_v43, %v924_v31  ;;  %v1560_v45 = vpack.c.bf16 %v1544_v26, %v1544_v26  ;;  %v1071_v52 = vadd.f32 %v2835_v53, %v984_v27 }
 0x13f   : > { %v956_v46 = vpack.c.bf16 %v940_v56, %v940_v56  ;;  %v1028_v33 = vmul.f32 %v1012_v37, %v2801_v9  ;;  %v1259_v50 = vmul.f32 %v2803_v12, %v1012_v37  ;;  %v1072_v55 = vadd.f32 %v1056_v2, %v985_v32 }
 0x140   : > { %v957_v59 = vpack.c.bf16 %v941_v20, %v941_v20  ;;  %v1114_v62 = vmul.f32 %v1098_v40, %v2817_v29  ;;  %v2953_v5 = vunpack.c.l.bf16 %v1197_v11  ;;  %v2957_v63 = vmul.f32 %v2825_v44, %v2901_v22 }
 0x141   : > { %v972_v1 = vunpack.c.l.bf16 %v956_v46  ;;  %v1115_v49 = vmul.f32 %v1099_v41, %v2817_v29  ;;  %v2960_v4 = vunpack.c.l.bf16 %v1343_v30  ;;  %v1201_v53 = vpack.c.bf16 %v1185_v42, %v1185_v42 }
 0x142   : > { %v973_v23 = vunpack.c.l.bf16 %v957_v59  ;;  %v2964_v2 = vunpack.c.l.bf16 %v1414_v35  ;;  %v2966_v26 = vunpack.c.l.bf16 %v1560_v45  ;;  %v1044_v11 = vpack.c.bf16 %v1028_v33, %v1028_v33 }
 0x143   : > { %3643 = vst [vmem:[#allocation40_spill] sm:$0xff] %v2960_v4  ;;  %v1275_v27 = vpack.c.bf16 %v1259_v50, %v1259_v50  ;;  %v2968_v32 = vadd.f32 %v1142_v8, %v1071_v52  ;;  %v2970_v22 = vadd.f32 %v1143_v25, %v1072_v55  ;;  %v1130_v14 = vpack.c.bf16 %v1114_v62, %v1114_v62 }
 0x144   : > { %v1331_v56 = vmul.f32 %v2825_v44, %v1098_v40  ;;  %v988_v30 = vadd.f32 %v2890_v57, %v972_v1  ;;  %v989_v20 = vadd.f32 %v2890_v57, %v973_v23  ;;  %v1131_v46 = vpack.c.bf16 %v1115_v49, %v1115_v49 }
 0x145   : > { %v2977_v35 = vmul.f32 %v2823_v43, %v2938_v34  ;;  %v2979_v42 = vunpack.c.l.bf16 %v1201_v53  ;;  %v1402_v45 = vmul.f32 %v2828_v47, %v924_v31  ;;  %v1476_v8 = vmul.f32 %v2806_v17, %v1012_v37  ;;  %v654_v53 = vpop.f32.mrf.mxu0 }
 0x146   : > { %v1548_v25 = vmul.f32 %v2830_v48, %v1098_v40  ;;  %v1060_v33 = vunpack.c.l.bf16 %v1044_v11  ;;  %v2984_v50 = vunpack.c.l.bf16 %v1275_v27  ;;  %v2987_v52 = vmul.f32 %v2825_v44, %v1099_v41 }
 0x147   : > { %3644 = vst [vmem:[#allocation41_spill] sm:$0xff] %v2979_v42  ;;  %v754_v55 = vunpack.c.l.b16 %v2920_v0  ;;  %v1146_v59 = vunpack.c.l.bf16 %v1130_v14  ;;  %v1347_v62 = vpack.c.bf16 %v1331_v56, %v1331_v56  ;;  %v1549_v1 = vmul.f32 %v2830_v48, %v1099_v41 }
 0x148   : > { %3645 = vst [vmem:[#allocation42_spill] sm:$0xff] %v2984_v50  ;;  %v1018_v49 = vunpack.c.l.bf16 %v2920_v0  ;;  %v1075_v31 = vadd.f32 %v2857_v13, %v988_v30  ;;  %v1076_v23 = vadd.f32 %v1060_v33, %v989_v20  ;;  %v1147_v37 = vunpack.c.l.bf16 %v1131_v46 }
 0x149   : > { %3646 = vst [vmem:[#allocation43_spill] sm:$0xff] %v2987_v52  ;;  %v766_v40 = vpack.c.b16 %v754_v55, %v753_v6  ;;  %v1418_v11 = vpack.c.bf16 %v1402_v45, %v1402_v45  ;;  %v1492_v27 = vpack.c.bf16 %v1476_v8, %v1476_v8  ;;  %v1564_v61 = vpack.c.bf16 %v1548_v25, %v1548_v25 }
 0x14a   : > { %v2995_v60 = vpack.c.bf16 %v654_v53, %v654_v53  ;;  %v1034_v56 = vmul.f32 %v1018_v49, %v2801_v9  ;;  %v1265_v41 = vmul.f32 %v2803_v12, %v1018_v49  ;;  %v2999_v0 = vunpack.c.l.bf16 %v1347_v62  ;;  %v664_v53 = vpop.f32.mrf.mxu1 }
 0x14b   : > { %v819_v39 = vshrl.u32 %v766_v40, 16  ;;  %v822_v14 = vshll.u32 %v766_v40, 16  ;;  %v3003_v13 = vmul.f32 %v2828_v47, %v2938_v34  ;;  %v1565_v28 = vpack.c.bf16 %v1549_v1, %v1549_v1 }
 0x14c   : > { %3647 = vst [vmem:[#allocation44_spill] sm:$0xff] %v2999_v0  ;;  %v1482_v6 = vmul.f32 %v2806_v17, %v1018_v49  ;;  %v3006_v30 = vadd.f32 %v1146_v59, %v1075_v31  ;;  %v1005_v45 = vunpack.c.l.bf16 %v2995_v60  ;;  %v3009_v8 = vadd.f32 %v1147_v37, %v1076_v23  ;;  %v674_v23 = vpop.f32.mrf.mxu2 }
 0x14d   : > { %v821_v20 = vrot.slane %v819_v39, 7  ;;  %v876_v46 = vrot.slane %v822_v14, 1  ;;  %v3011_v25 = vunpack.c.l.bf16 %v1418_v11  ;;  %v3013_v33 = vunpack.c.l.bf16 %v1492_v27 }
 0x14e   : > { %3648 = vst [vmem:[#allocation45_spill] sm:$0xff] %v3006_v30  ;;  %v3015_v55 = vunpack.c.l.bf16 %v1564_v61  ;;  %v1050_v40 = vpack.c.bf16 %v1034_v56, %v1034_v56  ;;  %v1281_v1 = vpack.c.bf16 %v1265_v41, %v1265_v41  ;;  %v3017_v49 = vunpack.c.l.bf16 %v1565_v28 }
 0x14f   : > { %3649 = vst [vmem:[#allocation46_spill] sm:$0xff] %v3009_v8  ;;  %v824_v62 = vor.u32 %v822_v14, %v821_v20  ;;  %v877_v34 = vor.u32 %v876_v46, %v819_v39  ;;  %v1498_v59 = vpack.c.bf16 %v1482_v6, %v1482_v6  ;;  %v3020_v30 = vpack.c.bf16 %v664_v53, %v664_v53 }
 0x150   : > { %3650 = vst [vmem:[#allocation47_spill] sm:$0xff] %v3011_v25  ;;  %v1021_v11 = vmul.f32 %v1005_v45, %v2801_v9  ;;  %v1252_v39 = vmul.f32 %v2803_v12, %v1005_v45  ;;  %v1066_v28 = vunpack.c.l.bf16 %v1050_v40  ;;  %v3030_v6 = vunpack.c.l.bf16 %v1281_v1 }
 0x151   : > { %3651 = vst [vmem:[#allocation48_spill] sm:$0xff] %v3013_v33  ;;  %v859_v37 = vsel %vm2853_vm4, 0, %v824_v62  ;;  %v902_v61 = vsel %vm2863_vm5, %v877_v34, 0  ;;  %v1009_v20 = vunpack.c.l.bf16 %v3020_v30  ;;  %v3033_v46 = vpack.c.bf16 %v674_v23, %v674_v23 }
 0x152   : > { %3652 = vst [vmem:[#allocation49_spill] sm:$0xff] %v3015_v55  ;;  %v930_v27 = vunpack.c.l.bf16 %v859_v37  ;;  %v931_v14 = vunpack.c.h.bf16 %v859_v37  ;;  %v1104_v56 = vunpack.c.l.bf16 %v902_v61  ;;  %v3028_v41 = vunpack.c.h.bf16 %v902_v61 }
 0x153   : > { %3653 = vst [vmem:[#allocation50_spill] sm:$0xff] %v3017_v49  ;;  %v3043_v1 = vunpack.c.l.bf16 %v1498_v59  ;;  %v1037_v23 = vpack.c.bf16 %v1021_v11, %v1021_v11  ;;  %v1013_v52 = vunpack.c.l.bf16 %v3033_v46  ;;  %v3048_v19 = vpack.c.bf16 %v689_v38, %v689_v38 }
 0x154   : > { %3654 = vst [vmem:[#allocation51_spill] sm:$0xff] %v3028_v41  ;;  %v946_v62 = vmul.f32 %v930_v27, %v2810_v21  ;;  %v947_v34 = vmul.f32 %v931_v14, %v2810_v21  ;;  %v1120_v53 = vmul.f32 %v1104_v56, %v2817_v29  ;;  %v1191_v45 = vmul.f32 %v2823_v43, %v930_v27 }
 0x155   : > { %3655 = vst [vmem:[#allocation52_spill] sm:$0xff] %v3030_v6  ;;  %v1337_v37 = vmul.f32 %v2825_v44, %v1104_v56  ;;  %v1338_v61 = vmul.f32 %v2825_v44, %v3028_v41  ;;  %v1408_v40 = vmul.f32 %v2828_v47, %v930_v27  ;;  %v1268_v6 = vpack.c.bf16 %v1252_v39, %v1252_v39 }
 0x156   : > { %3656 = vst [vmem:[#allocation53_spill] sm:$0xff] %v3033_v46  ;;  %v963_v31 = vpack.c.bf16 %v947_v34, %v947_v34  ;;  %v962_v0 = vpack.c.bf16 %v946_v62, %v946_v62  ;;  %v1136_v55 = vpack.c.bf16 %v1120_v53, %v1120_v53  ;;  %v1207_v33 = vpack.c.bf16 %v1191_v45, %v1191_v45 }
 0x157   : > { %3657 = vst [vmem:[#allocation54_spill] sm:$0xff] %v3043_v1  ;;  %v1025_v27 = vmul.f32 %v1009_v20, %v2801_v9  ;;  %v1353_v59 = vpack.c.bf16 %v1337_v37, %v1337_v37  ;;  %v1354_v1 = vpack.c.bf16 %v1338_v61, %v1338_v61  ;;  %v1424_v34 = vpack.c.bf16 %v1408_v40, %v1408_v40 }
 0x158   : > { %3658 = vst [vmem:[#allocation55_spill] sm:$0xff] %v3048_v19  ;;  %v979_v49 = vunpack.c.l.bf16 %v963_v31  ;;  %v1554_v11 = vmul.f32 %v2830_v48, %v1104_v56  ;;  %v1555_v39 = vmul.f32 %v2830_v48, %v3028_v41  ;;  %v3054_v62 = vunpack.c.l.bf16 %v1037_v23  ;;  %v656_v23 = vpop.f32.mrf.mxu0 }
 0x159   : > { %v3056_v50 = vunpack.c.l.bf16 %v1268_v6  ;;  %v1256_v38 = vmul.f32 %v2803_v12, %v1009_v20  ;;  %v978_v8 = vunpack.c.l.bf16 %v962_v0  ;;  %v3061_v53 = vmul.f32 %v2823_v43, %v931_v14 }
 0x15a   : > { %v995_v31 = vadd.f32 %v2890_v57, %v979_v49  ;;  %v1473_v45 = vmul.f32 %v2806_v17, %v1009_v20  ;;  %v3064_v37 = vunpack.c.l.bf16 %v1136_v55  ;;  %v3067_v56 = vmul.f32 %v2828_v47, %v931_v14 }
 0x15b   : > { %3659 = vst [vmem:[#allocation56_spill] sm:$0xff] %v3061_v53  ;;  %v1570_v61 = vpack.c.bf16 %v1554_v11, %v1554_v11  ;;  %v1041_v40 = vpack.c.bf16 %v1025_v27, %v1025_v27  ;;  %v3069_v6 = vunpack.c.l.bf16 %v1207_v33  ;;  %v3071_v41 = vunpack.c.l.bf16 %v1353_v59 }
 0x15c   : > { %3660 = vst [vmem:[#allocation57_spill] sm:$0xff] %v3064_v37  ;;  %v3073_v0 = vunpack.c.l.bf16 %v1354_v1  ;;  %v3075_v49 = vunpack.c.l.bf16 %v1424_v34  ;;  %v1571_v46 = vpack.c.bf16 %v1555_v39, %v1555_v39  ;;  %v1272_v53 = vpack.c.bf16 %v1256_v38, %v1256_v38 }
 0x15d   : > { %3661 = vst [vmem:[#allocation58_spill] sm:$0xff] %v3067_v56  ;;  %v3078_v20 = vmul.f32 %v1013_v52, %v2801_v9  ;;  %v3081_v55 = vmul.f32 %v2803_v12, %v1013_v52  ;;  %v3084_v14 = vadd.f32 %v2890_v57, %v978_v8  ;;  %v3086_v27 = vadd.f32 %v1066_v28, %v995_v31  ;;  %v666_v28 = vpop.f32.mrf.mxu1 }
 0x15e   : > { %3662 = vst [vmem:[#allocation59_spill] sm:$0xff] %v3069_v6  ;;  %v1489_v33 = vpack.c.bf16 %v1473_v45, %v1473_v45  ;;  %v702_v59 = vpack.c.bf16 %v656_v23, %v656_v23  ;;  %v3088_v11 = vunpack.c.l.bf16 %v1570_v61  ;;  %v3090_v1 = vunpack.c.l.bf16 %v1041_v40 }
 0x15f   : > { %3663 = vst [vmem:[#allocation60_spill] sm:$0xff] %v3071_v41  ;;  %v1250_v34 = vunpack.c.l.bf16 %v3048_v19  ;;  %v1182_v39 = vmul.f32 %v2823_v43, %v2899_v18  ;;  %v3096_v38 = vmul.f32 %v2806_v17, %v1013_v52  ;;  %v1399_v8 = vmul.f32 %v2828_v47, %v2899_v18 }
 0x160   : > { %3664 = vst [vmem:[#allocation61_spill] sm:$0xff] %v3073_v0  ;;  %v742_v0 = vunpack.c.l.b16 %v702_v59  ;;  %v1006_v41 = vunpack.c.l.bf16 %v702_v59  ;;  %v3100_v31 = vunpack.c.l.bf16 %v1571_v46  ;;  %v3102_v45 = vunpack.c.l.bf16 %v1272_v53 }
 0x161   : > { %3665 = vst [vmem:[#allocation62_spill] sm:$0xff] %v3075_v49  ;;  %v3108_v23 = vunpack.c.l.bf16 %v1489_v33  ;;  %v3674_v59 = vunpack.c.l.b16 %v2995_v60  ;;  %v3115_v46 = vmul.f32 %v1250_v34, %v2803_v12  ;;  %v1198_v53 = vpack.c.bf16 %v1182_v39, %v1182_v39 }
 0x162   : > { %3666 = vst [vmem:[#allocation63_spill] sm:$0xff] %v3078_v20  ;;  %v1022_v18 = vmul.f32 %v1006_v41, %v2801_v9  ;;  %v706_v49 = vpack.c.bf16 %v666_v28, %v666_v28  ;;  %v1415_v6 = vpack.c.bf16 %v1399_v8, %v1399_v8 }
 0x163   : > { %3667 = vst [vmem:[#allocation64_spill] sm:$0xff] %v3081_v55  ;;  %v3129_v28 = vunpack.c.l.bf16 %v1198_v53 }
 0x164   : > { %3668 = vst [vmem:[#allocation65_spill] sm:$0xff] %v3084_v14  ;;  %v1038_v56 = vpack.c.bf16 %v1022_v18, %v1022_v18  ;;  %v3120_v60 = vunpack.c.l.bf16 %v706_v49  ;;  %v3138_v61 = vunpack.c.l.bf16 %v1415_v6  ;;  %v1344_v14 = vpack.c.bf16 %v2957_v63, %v2957_v63 }
 0x165   : > { %3669 = vst [vmem:[#allocation66_spill] sm:$0xff] %v3086_v27  ;;  %v746_v27 = vunpack.c.l.b16 %v706_v49  ;;  %v3678_v49 = vunpack.c.l.b16 %v3020_v30 }
 0x166   : > { %3670 = vst [vmem:[#allocation67_spill] sm:$0xff] %v3088_v11  ;;  %v760_v11 = vpack.c.b16 %v742_v0, %v3674_v59  ;;  %v3123_v0 = vmul.f32 %v2806_v17, %v1250_v34  ;;  %v1054_v19 = vunpack.c.l.bf16 %v1038_v56  ;;  %v1257_v63 = vmul.f32 %v2803_v12, %v3120_v60  ;;  %v3725_v10 = vld [vmem:[#allocation60_spill] sm:$0xff] }
 0x167   : > { %3671 = vst [vmem:[#allocation68_spill] sm:$0xff] %v3096_v38  ;;  %v3164_v42 = vunpack.c.l.bf16 %v1344_v14 }
 0x168   : > { %3672 = vst [vmem:[#allocation69_spill] sm:$0xff] %v3100_v31  ;;  %v1253_v31 = vmul.f32 %v2803_v12, %v1006_v41  ;;  %v777_v40 = vshrl.u32 %v760_v11, 16  ;;  %v780_v33 = vshll.u32 %v760_v11, 16  ;;  %v1202_v41 = vpack.c.bf16 %v2977_v35, %v2977_v35 }
 0x169   : > { %3673 = vst [vmem:[#allocation70_spill] sm:$0xff] %v3108_v23  ;;  %v3677_v11 = vpack.c.bf16 %v2942_v36, %v2942_v36  ;;  %v3142_v35 = vmul.f32 %v3120_v60, %v2801_v9  ;;  %v1273_v25 = vpack.c.bf16 %v1257_v63, %v1257_v63 }
 0x16a   : > { %3675 = vst [vmem:[#allocation71_spill] sm:$0xff] %v3115_v46  ;;  %v1269_v52 = vpack.c.bf16 %v1253_v31, %v1253_v31  ;;  %v779_v59 = vrot.slane %v777_v40, 7  ;;  %v864_v37 = vrot.slane %v780_v33, 1  ;;  %v762_v31 = vpack.c.b16 %v746_v27, %v3678_v49 }
 0x16b   : > { %3676 = vst [vmem:[#allocation72_spill] sm:$0xff] %v3123_v0  ;;  %v3134_v8 = vunpack.c.l.bf16 %v3677_v11 }
 0x16c   : > { %v782_v34 = vor.u32 %v780_v33, %v779_v59  ;;  %v865_v18 = vor.u32 %v864_v37, %v777_v40  ;;  %v1285_v39 = vunpack.c.l.bf16 %v1269_v52  ;;  %v791_v53 = vshrl.u32 %v762_v31, 16 }
 0x16d   : > { %v794_v27 = vshll.u32 %v762_v31, 16  ;;  %v3150_v37 = vunpack.c.l.bf16 %v1202_v41  ;;  %v1042_v52 = vpack.c.bf16 %v3142_v35, %v3142_v35 }
 0x16e   : > { %v853_v36 = vsel %vm2853_vm4, 0, %v782_v34  ;;  %v896_v30 = vsel %vm2863_vm5, %v865_v18, 0  ;;  %v793_v11 = vrot.slane %v791_v53, 7 }
 0x16f   : > { %3679 = vst [vmem:[#allocation73_spill] sm:$0xff] %v3150_v37  ;;  %v918_v6 = vunpack.c.l.bf16 %v853_v36  ;;  %v919_v40 = vunpack.c.h.bf16 %v853_v36  ;;  %v1092_v33 = vunpack.c.l.bf16 %v896_v30  ;;  %v1093_v59 = vunpack.c.h.bf16 %v896_v30 }
 0x170   : > { %v868_v56 = vrot.slane %v794_v27, 1 }
 0x171   : > { %v934_v49 = vmul.f32 %v918_v6, %v2810_v21  ;;  %v935_v34 = vmul.f32 %v919_v40, %v2810_v21  ;;  %v1108_v31 = vmul.f32 %v1092_v33, %v2817_v29  ;;  %v1109_v41 = vmul.f32 %v1093_v59, %v2817_v29 }
 0x172   : > { %v1179_v18 = vmul.f32 %v2823_v43, %v918_v6  ;;  %v1180_v36 = vmul.f32 %v2823_v43, %v919_v40  ;;  %v1325_v30 = vmul.f32 %v2825_v44, %v1092_v33  ;;  %v1326_v46 = vmul.f32 %v2825_v44, %v1093_v59 }
 0x173   : > { %v950_v35 = vpack.c.bf16 %v934_v49, %v934_v49  ;;  %v951_v38 = vpack.c.bf16 %v935_v34, %v935_v34  ;;  %v1124_v55 = vpack.c.bf16 %v1108_v31, %v1108_v31  ;;  %v1125_v20 = vpack.c.bf16 %v1109_v41, %v1109_v41 }
 0x174   : > { %v1195_v37 = vpack.c.bf16 %v1179_v18, %v1179_v18  ;;  %v1196_v0 = vpack.c.bf16 %v1180_v36, %v1180_v36  ;;  %v1341_v12 = vpack.c.bf16 %v1325_v30, %v1325_v30  ;;  %v1342_v9 = vpack.c.bf16 %v1326_v46, %v1326_v46 }
 0x175   : > { %v966_v23 = vunpack.c.l.bf16 %v950_v35  ;;  %v967_v24 = vunpack.c.l.bf16 %v951_v38  ;;  %v1140_v6 = vunpack.c.l.bf16 %v1124_v55  ;;  %v1141_v48 = vunpack.c.l.bf16 %v1125_v20 }
 0x176   : > { %v1211_v40 = vunpack.c.l.bf16 %v1195_v37  ;;  %v1212_v4 = vunpack.c.l.bf16 %v1196_v0  ;;  %v796_v49 = vor.u32 %v794_v27, %v793_v11  ;;  %v869_v34 = vor.u32 %v868_v56, %v791_v53 }
 0x177   : > { %v982_v33 = vadd.f32 %v2890_v57, %v966_v23  ;;  %v983_v59 = vadd.f32 %v2890_v57, %v967_v24  ;;  %v1357_v46 = vunpack.c.l.bf16 %v1341_v12  ;;  %v1358_v18 = vunpack.c.l.bf16 %v1342_v9 }
 0x178   : > { %v1227_v31 = vadd.f32 %v1211_v40, %v2924_v51  ;;  %v1228_v41 = vadd.f32 %v1212_v4, %v2931_v15  ;;  %v855_v20 = vsel %vm2853_vm4, 0, %v796_v49  ;;  %v898_v55 = vsel %vm2863_vm5, %v869_v34, 0 }
 0x179   : > { %v1069_v38 = vadd.f32 %v3054_v62, %v982_v33  ;;  %v1070_v14 = vadd.f32 %v1054_v19, %v983_v59  ;;  %v922_v0 = vunpack.c.l.bf16 %v855_v20  ;;  %v923_v53 = vunpack.c.h.bf16 %v855_v20 }
 0x17a   : > { %v1300_v23 = vadd.f32 %v3056_v50, %v1227_v31  ;;  %v1301_v24 = vadd.f32 %v1285_v39, %v1228_v41  ;;  %v1096_v37 = vunpack.c.l.bf16 %v898_v55  ;;  %v3176_v15 = vunpack.c.h.bf16 %v898_v55 }
 0x17b   : > { %v1156_v27 = vadd.f32 %v1140_v6, %v1069_v38  ;;  %v1157_v51 = vadd.f32 %v1141_v48, %v1070_v14  ;;  %v938_v19 = vmul.f32 %v922_v0, %v2810_v21  ;;  %v939_v4 = vmul.f32 %v923_v53, %v2810_v21 }
 0x17c   : > { %v1373_v9 = vadd.f32 %v1357_v46, %v1300_v23  ;;  %v1374_v12 = vadd.f32 %v1358_v18, %v1301_v24  ;;  %v1112_v11 = vmul.f32 %v1096_v37, %v2817_v29  ;;  %v1113_v50 = vmul.f32 %v3176_v15, %v2817_v29 }
 0x17d   : > { %v1229_v62 = vadd.f32 %v2953_v5, %v1156_v27  ;;  %v1419_v48 = vpack.c.bf16 %v3003_v13, %v3003_v13  ;;  %v954_v63 = vpack.c.bf16 %v938_v19, %v938_v19  ;;  %v955_v36 = vpack.c.bf16 %v939_v4, %v939_v4 }
 0x17e   : > { %v1446_v39 = vadd.f32 %v2964_v2, %v1373_v9  ;;  %v1447_v56 = vadd.f32 %v3138_v61, %v1374_v12  ;;  %v1230_v30 = vadd.f32 %v3129_v28, %v1157_v51  ;;  %v1058_v35 = vunpack.c.l.bf16 %v1042_v52 }
 0x17f   : > { %v1128_v6 = vpack.c.bf16 %v1112_v11, %v1112_v11  ;;  %v1289_v40 = vunpack.c.l.bf16 %v1273_v25  ;;  %v970_v59 = vunpack.c.l.bf16 %v954_v63  ;;  %v971_v49 = vunpack.c.l.bf16 %v955_v36  ;;  %v3681_v36 = vld [vmem:[#allocation34_spill] sm:$0xff] }
 0x180   : > { %v1519_v5 = vadd.f32 %v2840_v58, %v1446_v39  ;;  %v1520_v33 = vadd.f32 %v2927_v7, %v1447_v56  ;;  %v1302_v13 = vadd.f32 %v2837_v54, %v1229_v62  ;;  %v1129_v34 = vpack.c.bf16 %v1113_v50, %v1113_v50  ;;  %v3680_v56 = vld [vmem:[#allocation40_spill] sm:$0xff] }
 0x181   : > { %v1183_v2 = vmul.f32 %v2823_v43, %v922_v0  ;;  %v1184_v61 = vmul.f32 %v2823_v43, %v923_v53  ;;  %v986_v25 = vadd.f32 %v2890_v57, %v970_v59  ;;  %v987_v52 = vadd.f32 %v2890_v57, %v971_v49  ;;  %v3682_v49 = vld [vmem:[#allocation41_spill] sm:$0xff] }
 0x182   : > { %v1592_v31 = vadd.f32 %v2966_v26, %v1519_v5  ;;  %v1593_v28 = vadd.f32 %v3134_v8, %v1520_v33  ;;  %v1329_v7 = vmul.f32 %v2825_v44, %v1096_v37  ;;  %v1330_v54 = vmul.f32 %v2825_v44, %v3176_v15 }
 0x183   : > { %v1199_v58 = vpack.c.bf16 %v1183_v2, %v1183_v2  ;;  %v1200_v41 = vpack.c.bf16 %v1184_v61, %v1184_v61  ;;  %v1073_v38 = vadd.f32 %v3090_v1, %v986_v25  ;;  %v1144_v14 = vunpack.c.l.bf16 %v1128_v6 }
 0x184   : > { %v1608_v46 = vmax.f32 %v1592_v31, 0.0  ;;  %v1609_v18 = vmax.f32 %v1593_v28, 0.0  ;;  %v1345_v55 = vpack.c.bf16 %v1329_v7, %v1329_v7  ;;  %v1346_v8 = vpack.c.bf16 %v1330_v54, %v1330_v54 }
 0x185   : > { %v1215_v20 = vunpack.c.l.bf16 %v1199_v58  ;;  %v1216_v26 = vunpack.c.l.bf16 %v1200_v41  ;;  %v1303_v23 = vadd.f32 %v2922_v3, %v1230_v30  ;;  %v1074_v24 = vadd.f32 %v1058_v35, %v987_v52  ;;  %v676_v30 = vpop.f32.mrf.mxu2  ;;  %v3684_v52 = vld [vmem:[#allocation36_spill] sm:$0xff] }
 0x186   : > { %1624 = vst [vmem:[%s3204_s12] sm:$0xff] %v1608_v46  ;;  %v1145_v27 = vunpack.c.l.bf16 %v1129_v34  ;;  %v1474_v51 = vmul.f32 %v2806_v17, %v3120_v60  ;;  %v1361_v12 = vunpack.c.l.bf16 %v1345_v55  ;;  %v1362_v19 = vunpack.c.l.bf16 %v1346_v8  ;;  %v3683_v34 = vld [vmem:[#allocation47_spill] sm:$0xff]  ;;  %v3685_v41 = vld [vmem:[#allocation48_spill] sm:$0xff]  ;;  %v3686_v46 = vld [vmem:[#allocation70_spill] sm:$0xff] }
 0x187   : > { %1625 = vst [vmem:[%s3204_s12 + $0x8] sm:$0xff] %v1609_v18  ;;  %v1231_v1 = vadd.f32 %v1215_v20, %v2968_v32  ;;  %v1232_v9 = vadd.f32 %v1216_v26, %v2970_v22  ;;  %v1160_v4 = vadd.f32 %v1144_v14, %v1073_v38  ;;  %v1400_v3 = vmul.f32 %v2828_v47, %v922_v0  ;;  %v3687_v20 = vld [vmem:[#allocation53_spill] sm:$0xff] }
 0x188   : > { %v1401_v62 = vmul.f32 %v2828_v47, %v923_v53  ;;  %v1435_v11 = vunpack.c.l.bf16 %v1419_v48  ;;  %v1375_v63 = vadd.f32 %v3680_v56, %v1302_v13  ;;  %v1546_v60 = vmul.f32 %v3681_v36, %v1096_v37  ;;  %v3689_v8 = vld [vmem:[#allocation49_spill] sm:$0xff] }
 0x189   : > { %v1304_v50 = vadd.f32 %v3102_v45, %v1231_v1  ;;  %v1305_v39 = vadd.f32 %v1289_v40, %v1232_v9  ;;  %v1376_v32 = vadd.f32 %v3164_v42, %v1303_v23  ;;  %v1416_v35 = vpack.c.bf16 %v1400_v3, %v1400_v3  ;;  %v3692_v9 = vld [vmem:[#allocation33_spill] sm:$0xff] }
 0x18a   : > { %v1417_v22 = vpack.c.bf16 %v1401_v62, %v1401_v62  ;;  %v1490_v6 = vpack.c.bf16 %v1474_v51, %v1474_v51  ;;  %v1161_v5 = vadd.f32 %v1145_v27, %v1074_v24  ;;  %v1547_v0 = vmul.f32 %v3681_v36, %v3176_v15  ;;  %v3690_v24 = vld [vmem:[#allocation50_spill] sm:$0xff]  ;;  %v3691_v51 = vld [vmem:[#allocation32_spill] sm:$0xff] }
 0x18b   : > { %v1377_v33 = vadd.f32 %v1361_v12, %v1304_v50  ;;  %v1378_v59 = vadd.f32 %v1362_v19, %v1305_v39  ;;  %v1432_v53 = vunpack.c.l.bf16 %v1416_v35  ;;  %v1562_v45 = vpack.c.bf16 %v1546_v60, %v1546_v60  ;;  %v3694_v39 = vld [vmem:[#allocation73_spill] sm:$0xff] }
 0x18c   : > { %v1433_v48 = vunpack.c.l.bf16 %v1417_v22  ;;  %v710_v40 = vpack.c.bf16 %v676_v30, %v676_v30  ;;  %v1233_v13 = vadd.f32 %v3682_v49, %v1160_v4  ;;  %v1563_v61 = vpack.c.bf16 %v1547_v0, %v1547_v0  ;;  %v3700_v49 = vld [vmem:[#allocation43_spill] sm:$0xff] }
 0x18d   : > { %v1450_v37 = vadd.f32 %v3683_v34, %v1377_v33  ;;  %v1451_v2 = vadd.f32 %v1435_v11, %v1378_v59  ;;  %v1448_v42 = vadd.f32 %v1432_v53, %v1375_v63  ;;  %v1506_v28 = vunpack.c.l.bf16 %v1490_v6  ;;  %v3693_v11 = vld [vmem:[#allocation72_spill] sm:$0xff]  ;;  %v691_v6 = vpop.f32.mrf.mxu3  ;;  %v3695_v33 = vld [vmem:[#allocation63_spill] sm:$0xff] }
 0x18e   : > { %v1449_v31 = vadd.f32 %v1433_v48, %v1376_v32  ;;  %v750_v25 = vunpack.c.l.b16 %v710_v40  ;;  %v1578_v54 = vunpack.c.l.bf16 %v1562_v45  ;;  %v1014_v15 = vunpack.c.l.bf16 %v710_v40  ;;  %v3697_v53 = vld [vmem:[#allocation64_spill] sm:$0xff]  ;;  %v3699_v40 = vld [vmem:[#allocation35_spill] sm:$0xff] }
 0x18f   : > { %v1523_v58 = vadd.f32 %v3684_v52, %v1450_v37  ;;  %v1524_v7 = vadd.f32 %v3685_v41, %v1451_v2  ;;  %v1521_v18 = vadd.f32 %v3686_v46, %v1448_v42  ;;  %v1579_v14 = vunpack.c.l.bf16 %v1563_v61  ;;  %v3703_v52 = vld [vmem:[#allocation71_spill] sm:$0xff]  ;;  %v3705_v46 = vld [vmem:[#allocation42_spill] sm:$0xff] }
 0x190   : > { %v1522_v38 = vadd.f32 %v1506_v28, %v1449_v31  ;;  %v3688_v26 = vunpack.c.l.b16 %v3687_v20  ;;  %v1030_v1 = vmul.f32 %v1014_v15, %v3691_v51  ;;  %v1261_v12 = vmul.f32 %v3692_v9, %v1014_v15  ;;  %v3701_v31 = vld [vmem:[#allocation68_spill] sm:$0xff] }
 0x191   : > { %v1596_v23 = vadd.f32 %v3689_v8, %v1523_v58  ;;  %v1597_v27 = vadd.f32 %v3690_v24, %v1524_v7  ;;  %v1594_v19 = vadd.f32 %v1578_v54, %v1521_v18  ;;  %v1499_v50 = vpack.c.bf16 %v3693_v11, %v3693_v11 }
 0x192   : > { %v764_v55 = vpack.c.b16 %v750_v25, %v3688_v26  ;;  %v1595_v4 = vadd.f32 %v1579_v14, %v1522_v38  ;;  %v1234_v56 = vadd.f32 %v3694_v39, %v1161_v5  ;;  %v3696_v59 = vpack.c.bf16 %v3695_v33, %v3695_v33  ;;  %v3708_v33 = vld [vmem:[#allocation37_spill] sm:$0xff] }
 0x193   : > { %v1612_v63 = vmax.f32 %v1596_v23, 0.0  ;;  %v1613_v60 = vmax.f32 %v1597_v27, 0.0  ;;  %v1610_v30 = vmax.f32 %v1594_v19, 0.0  ;;  %v3698_v48 = vpack.c.bf16 %v3697_v53, %v3697_v53  ;;  %v3706_v27 = vld [vmem:[#allocation44_spill] sm:$0xff]  ;;  %v3709_v53 = vld [vmem:[#allocation51_spill] sm:$0xff] }
 0x194   : > { %v805_v3 = vshrl.u32 %v764_v55, 16  ;;  %v808_v62 = vshll.u32 %v764_v55, 16  ;;  %v1611_v32 = vmax.f32 %v1595_v4, 0.0  ;;  %v3237_v0 = vunpack.c.l.bf16 %v3696_v59 }
 0x195   : > { %v3242_v45 = vunpack.c.l.bf16 %v3698_v48  ;;  %v1306_v5 = vadd.f32 %v3699_v40, %v1233_v13  ;;  %1628 = vst [vmem:[%s3204_s12 + $0x20] sm:$0xff] %v1612_v63  ;;  %v1348_v34 = vpack.c.bf16 %v3700_v49, %v3700_v49  ;;  %v1046_v61 = vpack.c.bf16 %v1030_v1, %v1030_v1 }
 0x196   : > { %v807_v35 = vrot.slane %v805_v3, 7  ;;  %v872_v22 = vrot.slane %v808_v62, 1  ;;  %1626 = vst [vmem:[%s3204_s12 + $0x10] sm:$0xff] %v1610_v30  ;;  %v1277_v42 = vpack.c.bf16 %v1261_v12, %v1261_v12  ;;  %v3702_v28 = vpack.c.bf16 %v3701_v31, %v3701_v31 }
 0x197   : > { %v3704_v58 = vpack.c.bf16 %v3703_v52, %v3703_v52  ;;  %1627 = vst [vmem:[%s3204_s12 + $0x18] sm:$0xff] %v1611_v32  ;;  %v1478_v13 = vmul.f32 %v2806_v17, %v1014_v15  ;;  %v3261_v7 = vpack.c.bf16 %v691_v6, %v691_v6  ;;  %v3263_v54 = vunpack.c.l.bf16 %v1499_v50  ;;  %v3707_v6 = vld [vmem:[#allocation65_spill] sm:$0xff] }
 0x198   : > { %v810_v37 = vor.u32 %v808_v62, %v807_v35  ;;  %v873_v2 = vor.u32 %v872_v22, %v805_v3  ;;  %v3252_v25 = vunpack.c.l.bf16 %v3702_v28  ;;  %v1307_v18 = vadd.f32 %v3705_v46, %v1234_v56  ;;  %1629 = vst [vmem:[%s3204_s12 + $0x28] sm:$0xff] %v1613_v60  ;;  %v679_v56 = vpop.f32.mrf.mxu2 }
 0x199   : > { %v3257_v41 = vunpack.c.l.bf16 %v3704_v58  ;;  %v3271_v23 = vunpack.c.l.bf16 %v1046_v61  ;;  %v3273_v15 = vunpack.c.l.bf16 %v1277_v42  ;;  %v1364_v24 = vunpack.c.l.bf16 %v1348_v34 }
 0x19a   : > { %v857_v38 = vsel %vm2853_vm4, 0, %v810_v37  ;;  %v900_v14 = vsel %vm2863_vm5, %v873_v2, 0  ;;  %v1379_v1 = vadd.f32 %v3706_v27, %v1306_v5  ;;  %v1494_v4 = vpack.c.bf16 %v1478_v13, %v1478_v13  ;;  %v3710_v5 = vld [vmem:[#allocation55_spill] sm:$0xff]  ;;  %v3712_v2 = vld [vmem:[#allocation56_spill] sm:$0xff] }
 0x19b   : > { %v926_v20 = vunpack.c.l.bf16 %v857_v38  ;;  %v927_v26 = vunpack.c.h.bf16 %v857_v38  ;;  %v1100_v55 = vunpack.c.l.bf16 %v900_v14  ;;  %v1101_v8 = vunpack.c.h.bf16 %v900_v14 }
 0x19c   : > { %v756_v3 = vunpack.c.l.b16 %v3261_v7  ;;  %v1380_v32 = vadd.f32 %v1364_v24, %v1307_v18  ;;  %v1081_v59 = vadd.f32 %v3708_v33, %v3707_v6  ;;  %v3288_v48 = vmul.f32 %v3709_v53, %v2817_v29 }
 0x19d   : > { %v942_v12 = vmul.f32 %v926_v20, %v2810_v21  ;;  %v943_v19 = vmul.f32 %v927_v26, %v2810_v21  ;;  %v1116_v62 = vmul.f32 %v1100_v55, %v2817_v29  ;;  %v1117_v11 = vmul.f32 %v1101_v8, %v2817_v29 }
 0x19e   : > { %v1187_v50 = vmul.f32 %v2823_v43, %v926_v20  ;;  %v1188_v39 = vmul.f32 %v2823_v43, %v927_v26  ;;  %v1333_v30 = vmul.f32 %v2825_v44, %v1100_v55  ;;  %v1510_v40 = vunpack.c.l.bf16 %v1494_v4 }
 0x19f   : > { %v958_v63 = vpack.c.bf16 %v942_v12, %v942_v12  ;;  %v959_v60 = vpack.c.bf16 %v943_v19, %v943_v19  ;;  %v3711_v49 = vunpack.c.l.b16 %v3710_v5  ;;  %v3292_v37 = vpack.c.bf16 %v679_v56, %v679_v56 }
 0x1a0   : > { %v1203_v35 = vpack.c.bf16 %v1187_v50, %v1187_v50  ;;  %v1204_v22 = vpack.c.bf16 %v1188_v39, %v1188_v39  ;;  %v1208_v61 = vpack.c.bf16 %v3712_v2, %v3712_v2  ;;  %v1132_v31 = vpack.c.bf16 %v1116_v62, %v1116_v62 }
 0x1a1   : > { %v767_v34 = vpack.c.b16 %v756_v3, %v3711_v49  ;;  %v974_v42 = vunpack.c.l.bf16 %v958_v63  ;;  %v1133_v28 = vpack.c.bf16 %v1117_v11, %v1117_v11  ;;  %v1334_v52 = vmul.f32 %v2825_v44, %v1101_v8  ;;  %v3713_v3 = vld [vmem:[#allocation57_spill] sm:$0xff] }
 0x1a2   : > { %v975_v58 = vunpack.c.l.bf16 %v959_v60  ;;  %v1349_v13 = vpack.c.bf16 %v1333_v30, %v1333_v30  ;;  %v1404_v46 = vmul.f32 %v2828_v47, %v926_v20  ;;  %v1405_v18 = vmul.f32 %v2828_v47, %v927_v26 }
 0x1a3   : > { %v1219_v38 = vunpack.c.l.bf16 %v1203_v35  ;;  %v1220_v14 = vunpack.c.l.bf16 %v1204_v22  ;;  %v1550_v24 = vmul.f32 %v3681_v36, %v1100_v55  ;;  %v1551_v27 = vmul.f32 %v3681_v36, %v1101_v8  ;;  %v3714_v8 = vld [vmem:[#allocation45_spill] sm:$0xff]  ;;  %v3715_v35 = vld [vmem:[#allocation46_spill] sm:$0xff] }
 0x1a4   : > { %v1420_v12 = vpack.c.bf16 %v1404_v46, %v1404_v46  ;;  %v1421_v19 = vpack.c.bf16 %v1405_v18, %v1405_v18  ;;  %v1137_v4 = vpack.c.bf16 %v3288_v48, %v3288_v48  ;;  %v3304_v62 = vadd.f32 %v3713_v3, %v1081_v59 }
 0x1a5   : > { %v990_v11 = vadd.f32 %v2890_v57, %v974_v42  ;;  %v1350_v50 = vpack.c.bf16 %v1334_v52, %v1334_v52  ;;  %v1566_v20 = vpack.c.bf16 %v1550_v24, %v1550_v24  ;;  %v1567_v39 = vpack.c.bf16 %v1551_v27, %v1551_v27 }
 0x1a6   : > { %v1148_v26 = vunpack.c.l.bf16 %v1132_v31  ;;  %v1149_v56 = vunpack.c.l.bf16 %v1133_v28  ;;  %v1436_v63 = vunpack.c.l.bf16 %v1420_v12  ;;  %v1437_v60 = vunpack.c.l.bf16 %v1421_v19 }
 0x1a7   : > { %v991_v55 = vadd.f32 %v2890_v57, %v975_v58  ;;  %v1235_v30 = vadd.f32 %v1219_v38, %v3714_v8  ;;  %v1236_v22 = vadd.f32 %v1220_v14, %v3715_v35  ;;  %v1365_v6 = vunpack.c.l.bf16 %v1349_v13  ;;  %v694_v14 = vpop.f32.mrf.mxu3 }
 0x1a8   : > { %v1452_v33 = vadd.f32 %v1436_v63, %v1379_v1  ;;  %v1453_v53 = vadd.f32 %v1437_v60, %v1380_v32  ;;  %v826_v59 = vshrl.u32 %v767_v34, 16  ;;  %v829_v48 = vshll.u32 %v767_v34, 16 }
 0x1a9   : > { %v1077_v5 = vadd.f32 %v3237_v0, %v990_v11  ;;  %v1582_v49 = vunpack.c.l.bf16 %v1566_v20  ;;  %v1583_v42 = vunpack.c.l.bf16 %v1567_v39  ;;  %v1251_v31 = vunpack.c.l.bf16 %v3261_v7 }
 0x1aa   : > { %v1525_v28 = vadd.f32 %v3252_v25, %v1452_v33  ;;  %v1526_v52 = vadd.f32 %v1510_v40, %v1453_v53  ;;  %v828_v46 = vrot.slane %v826_v59, 7  ;;  %v878_v57 = vrot.slane %v829_v48, 1 }
 0x1ab   : > { %v1078_v58 = vadd.f32 %v3271_v23, %v991_v55  ;;  %v1366_v18 = vunpack.c.l.bf16 %v1350_v50  ;;  %v1267_v13 = vmul.f32 %v1251_v31, %v3692_v9  ;;  %v1015_v1 = vunpack.c.l.bf16 %v3292_v37 }
 0x1ac   : > { %v1598_v32 = vadd.f32 %v1582_v49, %v1525_v28  ;;  %v1599_v34 = vadd.f32 %v1583_v42, %v1526_v52  ;;  %v831_v38 = vor.u32 %v829_v48, %v828_v46  ;;  %v879_v0 = vor.u32 %v878_v57, %v826_v59 }
 0x1ad   : > { %v3316_v24 = vadd.f32 %v1148_v26, %v1077_v5  ;;  %v1308_v25 = vadd.f32 %v3242_v45, %v1235_v30  ;;  %v1309_v7 = vadd.f32 %v3273_v15, %v1236_v22  ;;  %v1484_v23 = vmul.f32 %v2806_v17, %v1251_v31  ;;  %v3716_v31 = vld [vmem:[#allocation66_spill] sm:$0xff] }
 0x1ae   : > { %v1614_v40 = vmax.f32 %v1598_v32, 0.0  ;;  %v1615_v27 = vmax.f32 %v1599_v34, 0.0  ;;  %v860_v12 = vsel %vm2853_vm4, 0, %v831_v38  ;;  %v903_v19 = vsel %vm2863_vm5, %v879_v0, 0 }
 0x1af   : > { %v1177_v3 = vunpack.c.l.bf16 %v860_v12  ;;  %v1178_v11 = vunpack.c.h.bf16 %v860_v12  ;;  %v1323_v50 = vunpack.c.l.bf16 %v903_v19  ;;  %v1031_v20 = vmul.f32 %v1015_v1, %v3691_v51  ;;  %v696_v0 = vpop.f32.mrf.mxu3 }
 0x1b0   : > { %v3326_v39 = vadd.f32 %v1149_v56, %v1078_v58  ;;  %1630 = vst [vmem:[%s3204_s12 + $0x30] sm:$0xff] %v1614_v40  ;;  %v1153_v45 = vunpack.c.l.bf16 %v1137_v4  ;;  %v1283_v15 = vpack.c.bf16 %v1267_v13, %v1267_v13  ;;  %v1324_v26 = vunpack.c.h.bf16 %v903_v19  ;;  %v681_v58 = vpop.f32.mrf.mxu2 }
 0x1b1   : > { %1631 = vst [vmem:[%s3204_s12 + $0x38] sm:$0xff] %v1615_v27  ;;  %v1193_v63 = vmul.f32 %v1177_v3, %v2823_v43  ;;  %v1194_v60 = vmul.f32 %v1178_v11, %v2823_v43  ;;  %v1339_v55 = vmul.f32 %v1323_v50, %v2825_v44  ;;  %v1410_v8 = vmul.f32 %v2828_v47, %v1177_v3 }
 0x1b2   : > { %v1340_v30 = vmul.f32 %v1324_v26, %v2825_v44  ;;  %v1411_v35 = vmul.f32 %v2828_v47, %v1178_v11  ;;  %v1500_v22 = vpack.c.bf16 %v1484_v23, %v1484_v23  ;;  %v1556_v56 = vmul.f32 %v3681_v36, %v1323_v50 }
 0x1b3   : > { %v1209_v33 = vpack.c.bf16 %v1193_v63, %v1193_v63  ;;  %v1557_v4 = vmul.f32 %v3681_v36, %v1324_v26  ;;  %v1047_v53 = vpack.c.bf16 %v1031_v20, %v1031_v20  ;;  %v1262_v59 = vmul.f32 %v3692_v9, %v1015_v1 }
 0x1b4   : > { %v3339_v48 = vadd.f32 %v1365_v6, %v1308_v25  ;;  %v3341_v5 = vadd.f32 %v1366_v18, %v1309_v7  ;;  %v1210_v49 = vpack.c.bf16 %v1194_v60, %v1194_v60  ;;  %v1355_v42 = vpack.c.bf16 %v1339_v55, %v1339_v55 }
 0x1b5   : > { %v1169_v28 = vadd.f32 %v1153_v45, %v3716_v31  ;;  %v1356_v52 = vpack.c.bf16 %v1340_v30, %v1340_v30  ;;  %v1426_v46 = vpack.c.bf16 %v1410_v8, %v1410_v8  ;;  %v751_v57 = vunpack.c.l.b16 %v3292_v37 }
 0x1b6   : > { %v1299_v13 = vunpack.c.l.bf16 %v1283_v15  ;;  %v1427_v32 = vpack.c.bf16 %v1411_v35, %v1411_v35  ;;  %v3345_v34 = vunpack.c.l.bf16 %v1500_v22  ;;  %v1572_v38 = vpack.c.bf16 %v1556_v56, %v1556_v56 }
 0x1b7   : > { %v1225_v23 = vunpack.c.l.bf16 %v1209_v33  ;;  %v1573_v6 = vpack.c.bf16 %v1557_v4, %v1557_v4  ;;  %v3347_v25 = vunpack.c.l.bf16 %v1047_v53  ;;  %v1278_v18 = vpack.c.bf16 %v1262_v59, %v1262_v59 }
 0x1b8   : > { %v1226_v7 = vunpack.c.l.bf16 %v1210_v49  ;;  %v3349_v40 = vunpack.c.l.bf16 %v1355_v42  ;;  %v717_v27 = vpack.c.bf16 %v694_v14, %v694_v14  ;;  %v712_v12 = vpack.c.bf16 %v681_v58, %v681_v58 }
 0x1b9   : > { %v3351_v19 = vunpack.c.l.bf16 %v1356_v52  ;;  %v3353_v37 = vunpack.c.l.bf16 %v1426_v46  ;;  %v1479_v3 = vmul.f32 %v2806_v17, %v1015_v1  ;;  %v718_v11 = vpack.c.bf16 %v696_v0, %v696_v0 }
 0x1ba   : > { %v3356_v50 = vunpack.c.l.bf16 %v1427_v32  ;;  %v3358_v20 = vunpack.c.l.bf16 %v1572_v38  ;;  %v752_v45 = vunpack.c.l.b16 %v712_v12  ;;  %v1016_v15 = vunpack.c.l.bf16 %v712_v12 }
 0x1bb   : > { %v1241_v26 = vadd.f32 %v1225_v23, %v3304_v62  ;;  %v3361_v63 = vunpack.c.l.bf16 %v1573_v6  ;;  %v757_v60 = vunpack.c.l.b16 %v717_v27  ;;  %v1469_v14 = vunpack.c.l.bf16 %v717_v27 }
 0x1bc   : > { %v1242_v55 = vadd.f32 %v1226_v7, %v1169_v28  ;;  %v765_v8 = vpack.c.b16 %v752_v45, %v751_v57  ;;  %v1032_v30 = vmul.f32 %v1016_v15, %v3691_v51  ;;  %v1263_v35 = vmul.f32 %v3692_v9, %v1016_v15  ;;  %v3717_v9 = vld [vmem:[#allocation58_spill] sm:$0xff] }
 0x1bd   : > { %v3365_v1 = vunpack.c.l.bf16 %v1278_v18  ;;  %v1495_v22 = vpack.c.bf16 %v1479_v3, %v1479_v3  ;;  %v3370_v56 = vunpack.c.l.bf16 %v1208_v61  ;;  %v758_v33 = vunpack.c.l.b16 %v718_v11 }
 0x1be   : > { %v812_v62 = vshrl.u32 %v765_v8, 16  ;;  %v815_v4 = vshll.u32 %v765_v8, 16  ;;  %v1480_v53 = vmul.f32 %v2806_v17, %v1016_v15  ;;  %v1470_v59 = vunpack.c.l.bf16 %v718_v11 }
 0x1bf   : > { %v3374_v49 = vadd.f32 %v3257_v41, %v1241_v26  ;;  %v3377_v51 = vmul.f32 %v1469_v14, %v2806_v17  ;;  %v1425_v42 = vpack.c.bf16 %v3717_v9, %v3717_v9  ;;  %v768_v31 = vpack.c.b16 %v758_v33, %v757_v60 }
 0x1c0   : > { %v814_v28 = vrot.slane %v812_v62, 7  ;;  %v874_v2 = vrot.slane %v815_v4, 1  ;;  %v1048_v61 = vpack.c.bf16 %v1032_v30, %v1032_v30  ;;  %v1279_v52 = vpack.c.bf16 %v1263_v35, %v1263_v35 }
 0x1c1   : > { %v3381_v46 = vadd.f32 %v1299_v13, %v1242_v55  ;;  %v3383_v57 = vunpack.c.l.bf16 %v1495_v22  ;;  %v833_v58 = vshrl.u32 %v768_v31, 16  ;;  %v836_v32 = vshll.u32 %v768_v31, 16 }
 0x1c2   : > { %v817_v38 = vor.u32 %v815_v4, %v814_v28  ;;  %v875_v41 = vor.u32 %v874_v2, %v812_v62  ;;  %v1496_v0 = vpack.c.bf16 %v1480_v53, %v1480_v53  ;;  %v3386_v23 = vmul.f32 %v1470_v59, %v2806_v17 }
 0x1c3   : > { %v1501_v6 = vpack.c.bf16 %v3377_v51, %v3377_v51  ;;  %v3390_v18 = vunpack.c.l.bf16 %v1425_v42  ;;  %v835_v7 = vrot.slane %v833_v58, 7  ;;  %v880_v27 = vrot.slane %v836_v32, 1 }
 0x1c4   : > { %v858_v13 = vsel %vm2853_vm4, 0, %v817_v38  ;;  %v901_v12 = vsel %vm2863_vm5, %v875_v41, 0  ;;  %v1064_v3 = vunpack.c.l.bf16 %v1048_v61  ;;  %v1295_v11 = vunpack.c.l.bf16 %v1279_v52 }
 0x1c5   : > { %v928_v45 = vunpack.c.l.bf16 %v858_v13  ;;  %v929_v15 = vunpack.c.h.bf16 %v858_v13  ;;  %v1102_v26 = vunpack.c.l.bf16 %v901_v12  ;;  %v1103_v17 = vunpack.c.h.bf16 %v901_v12 }
 0x1c6   : > { %v3396_v60 = vunpack.c.l.bf16 %v1496_v0  ;;  %v838_v14 = vor.u32 %v836_v32, %v835_v7  ;;  %v881_v55 = vor.u32 %v880_v27, %v833_v58  ;;  %v1502_v8 = vpack.c.bf16 %v3386_v23, %v3386_v23 }
 0x1c7   : > { %v944_v30 = vmul.f32 %v928_v45, %v2810_v21  ;;  %v945_v35 = vmul.f32 %v929_v15, %v2810_v21  ;;  %v1118_v22 = vmul.f32 %v1102_v26, %v2817_v29  ;;  %v1119_v33 = vmul.f32 %v1103_v17, %v2817_v29 }
 0x1c8   : > { %v1189_v62 = vmul.f32 %v2823_v43, %v928_v45  ;;  %v1190_v4 = vmul.f32 %v2823_v43, %v929_v15  ;;  %v1335_v53 = vmul.f32 %v2825_v44, %v1102_v26  ;;  %v1336_v59 = vmul.f32 %v2825_v44, %v1103_v17  ;;  %v2137_v44 = vld [vmem:[%s3641_s16] ss:$0 sm:$0xff] }
 0x1c9   : > { %v960_v9 = vpack.c.bf16 %v944_v30, %v944_v30  ;;  %v961_v42 = vpack.c.bf16 %v945_v35, %v945_v35  ;;  %v1134_v31 = vpack.c.bf16 %v1118_v22, %v1118_v22  ;;  %v1135_v28 = vpack.c.bf16 %v1119_v33, %v1119_v33 }
 0x1ca   : > { %v1205_v2 = vpack.c.bf16 %v1189_v62, %v1189_v62  ;;  %v1206_v61 = vpack.c.bf16 %v1190_v4, %v1190_v4  ;;  %v1351_v52 = vpack.c.bf16 %v1335_v53, %v1335_v53  ;;  %v1352_v21 = vpack.c.bf16 %v1336_v59, %v1336_v59 }
 0x1cb   : > { %v976_v58 = vunpack.c.l.bf16 %v960_v9  ;;  %v977_v32 = vunpack.c.l.bf16 %v961_v42  ;;  %v1150_v38 = vunpack.c.l.bf16 %v1134_v31  ;;  %v1151_v29 = vunpack.c.l.bf16 %v1135_v28 }
 0x1cc   : > { %v1221_v41 = vunpack.c.l.bf16 %v1205_v2  ;;  %v1222_v0 = vunpack.c.l.bf16 %v1206_v61  ;;  %v1367_v7 = vunpack.c.l.bf16 %v1351_v52  ;;  %v1368_v43 = vunpack.c.l.bf16 %v1352_v21 }
 0x1cd   : > { %v992_v27 = vadd.f32 %v2137_v44, %v976_v58  ;;  %v993_v13 = vadd.f32 %v2137_v44, %v977_v32  ;;  %v1406_v12 = vmul.f32 %v2828_v47, %v928_v45  ;;  %v1407_v30 = vmul.f32 %v2828_v47, %v929_v15  ;;  %v3718_v58 = vld [vmem:[#allocation59_spill] sm:$0xff] }
 0x1ce   : > { %v1237_v35 = vadd.f32 %v1221_v41, %v3316_v24  ;;  %v1238_v22 = vadd.f32 %v1222_v0, %v3326_v39  ;;  %v1552_v33 = vmul.f32 %v3681_v36, %v1102_v26  ;;  %v1553_v62 = vmul.f32 %v3681_v36, %v1103_v17  ;;  %v3721_v0 = vld [vmem:[#allocation38_spill] sm:$0xff]  ;;  %v3723_v44 = vld [vmem:[#allocation39_spill] sm:$0xff] }
 0x1cf   : > { %v1079_v4 = vadd.f32 %v3347_v25, %v992_v27  ;;  %v1080_v53 = vadd.f32 %v1064_v3, %v993_v13  ;;  %v1422_v59 = vpack.c.bf16 %v1406_v12, %v1406_v12  ;;  %v1423_v9 = vpack.c.bf16 %v1407_v30, %v1407_v30  ;;  %v3724_v13 = vld [vmem:[#allocation54_spill] sm:$0xff] }
 0x1d0   : > { %v1310_v42 = vadd.f32 %v3365_v1, %v1237_v35  ;;  %v1311_v31 = vadd.f32 %v1295_v11, %v1238_v22  ;;  %v1568_v28 = vpack.c.bf16 %v1552_v33, %v1552_v33  ;;  %v1569_v45 = vpack.c.bf16 %v1553_v62, %v1553_v62  ;;  %v3719_v1 = vld [vmem:[#allocation62_spill] sm:$0xff]  ;;  %v3727_v33 = vld [vmem:[#allocation67_spill] sm:$0xff] }
 0x1d1   : > { %v1166_v2 = vadd.f32 %v1150_v38, %v1079_v4  ;;  %v1167_v15 = vadd.f32 %v1151_v29, %v1080_v53  ;;  %v1438_v61 = vunpack.c.l.bf16 %v1422_v59  ;;  %v1439_v24 = vunpack.c.l.bf16 %v1423_v9 }
 0x1d2   : > { %v1383_v52 = vadd.f32 %v1367_v7, %v1310_v42  ;;  %v1384_v39 = vadd.f32 %v1368_v43, %v1311_v31  ;;  %v1584_v21 = vunpack.c.l.bf16 %v1568_v28  ;;  %v1585_v26 = vunpack.c.l.bf16 %v1569_v45  ;;  %v3722_v43 = vld [vmem:[#allocation52_spill] sm:$0xff] }
 0x1d3   : > { %v1239_v17 = vadd.f32 %v3718_v58, %v1166_v2  ;;  %v1240_v25 = vadd.f32 %v3370_v56, %v1167_v15  ;;  %v1454_v3 = vadd.f32 %v1438_v61, %v3339_v48  ;;  %v1455_v32 = vadd.f32 %v1439_v24, %v3341_v5 }
 0x1d4   : > { %v1456_v11 = vadd.f32 %v3719_v1, %v1383_v52  ;;  %v1457_v38 = vadd.f32 %v3390_v18, %v1384_v39  ;;  %v861_v29 = vsel %vm2853_vm4, 0, %v838_v14  ;;  %v904_v41 = vsel %vm2863_vm5, %v881_v55, 0  ;;  %v3726_v14 = vld [vmem:[#allocation61_spill] sm:$0xff] }
 0x1d5   : > { %v1312_v7 = vadd.f32 %v3721_v0, %v1239_v17  ;;  %v1313_v56 = vadd.f32 %v3722_v43, %v1240_v25  ;;  %v1527_v48 = vadd.f32 %v3383_v57, %v1454_v3  ;;  %v1528_v5 = vadd.f32 %v3396_v60, %v1455_v32  ;;  %v3728_v57 = vld [vmem:[#allocation69_spill] sm:$0xff] }
 0x1d6   : > { %v1529_v27 = vadd.f32 %v3723_v44, %v1456_v11  ;;  %v1530_v12 = vadd.f32 %v3724_v13, %v1457_v38  ;;  %v1396_v18 = vunpack.c.l.bf16 %v861_v29  ;;  %v1397_v30 = vunpack.c.h.bf16 %v861_v29 }
 0x1d7   : > { %v1385_v35 = vadd.f32 %v3725_v10, %v1312_v7  ;;  %v1386_v22 = vadd.f32 %v3726_v14, %v1313_v56  ;;  %v1600_v16 = vadd.f32 %v1584_v21, %v1527_v48  ;;  %v1601_v55 = vadd.f32 %v1585_v26, %v1528_v5 }
 0x1d8   : > { %v1602_v62 = vadd.f32 %v3727_v33, %v1529_v27  ;;  %v1603_v4 = vadd.f32 %v3728_v57, %v1530_v12  ;;  %v1412_v60 = vmul.f32 %v1396_v18, %v2828_v47  ;;  %v1413_v53 = vmul.f32 %v1397_v30, %v2828_v47 }
 0x1d9   : > { %v1458_v59 = vadd.f32 %v3353_v37, %v1385_v35  ;;  %v1459_v9 = vadd.f32 %v3356_v50, %v1386_v22  ;;  %v1616_v42 = vmax.f32 %v1600_v16, 0.0  ;;  %v1617_v31 = vmax.f32 %v1601_v55, 0.0 }
 0x1da   : > { %v1618_v28 = vmax.f32 %v1602_v62, 0.0  ;;  %v1619_v45 = vmax.f32 %v1603_v4, 0.0  ;;  %v1428_v2 = vpack.c.bf16 %v1412_v60, %v1412_v60  ;;  %v1429_v15 = vpack.c.bf16 %v1413_v53, %v1413_v53 }
 0x1db   : > { %v1531_v61 = vadd.f32 %v3263_v54, %v1458_v59  ;;  %v1532_v24 = vadd.f32 %v3345_v34, %v1459_v9  ;;  %1632 = vst [vmem:[%s3204_s12 + $0x40] sm:$0xff] %v1616_v42  ;;  %v1542_v47 = vunpack.c.l.bf16 %v904_v41  ;;  %v1543_v37 = vunpack.c.h.bf16 %v904_v41 }
 0x1dc   : > { %v1387_v50 = vadd.f32 %v3349_v40, %v3374_v49  ;;  %v1388_v52 = vadd.f32 %v3351_v19, %v3381_v46  ;;  %1633 = vst [vmem:[%s3204_s12 + $0x48] sm:$0xff] %v1617_v31  ;;  %v1444_v39 = vunpack.c.l.bf16 %v1428_v2  ;;  %v1445_v21 = vunpack.c.l.bf16 %v1429_v15 }
 0x1dd   : > { %v1604_v26 = vadd.f32 %v3358_v20, %v1531_v61  ;;  %v1605_v58 = vadd.f32 %v3361_v63, %v1532_v24  ;;  %1634 = vst [vmem:[%s3204_s12 + $0x50] sm:$0xff] %v1618_v28  ;;  %v1558_v54 = vmul.f32 %v1542_v47, %v3681_v36  ;;  %v1559_v34 = vmul.f32 %v1543_v37, %v3681_v36 }
 0x1de   : > { %v1517_v40 = vunpack.c.l.bf16 %v1501_v6  ;;  %1635 = vst [vmem:[%s3204_s12 + $0x58] sm:$0xff] %v1619_v45  ;;  %v1460_v19 = vadd.f32 %v1444_v39, %v1387_v50  ;;  %v1461_v49 = vadd.f32 %v1445_v21, %v1388_v52  ;;  %v1518_v20 = vunpack.c.l.bf16 %v1502_v8 }
 0x1df   : > { %v1620_v63 = vmax.f32 %v1604_v26, 0.0  ;;  %v1621_v46 = vmax.f32 %v1605_v58, 0.0  ;;  %v1574_v17 = vpack.c.bf16 %v1558_v54, %v1558_v54  ;;  %v1575_v25 = vpack.c.bf16 %v1559_v34, %v1559_v34 }
 0x1e0   : > { %v1533_v36 = vadd.f32 %v1517_v40, %v1460_v19  ;;  %v1534_v3 = vadd.f32 %v1518_v20, %v1461_v49 }
 0x1e1   : > { %1636 = vst [vmem:[%s3204_s12 + $0x60] sm:$0xff] %v1620_v63  ;;  %v1590_v51 = vunpack.c.l.bf16 %v1574_v17  ;;  %v1591_v6 = vunpack.c.l.bf16 %v1575_v25 }
 0x1e2   : > { %1637 = vst [vmem:[%s3204_s12 + $0x68] sm:$0xff] %v1621_v46 }
 0x1e3   : > { %v1606_v23 = vadd.f32 %v1590_v51, %v1533_v36  ;;  %v1607_v8 = vadd.f32 %v1591_v6, %v1534_v3 }
 0x1e5   : > { %v1622_v32 = vmax.f32 %v1606_v23, 0.0  ;;  %v1623_v1 = vmax.f32 %v1607_v8, 0.0 }
 0x1e7   : > { %1638 = vst [vmem:[%s3204_s12 + $0x70] sm:$0xff] %v1622_v32 }
 0x1e8   : > { %1639 = vst [vmem:[%s3204_s12 + $0x78] sm:$0xff] %v1623_v1 }
 0x1e9   : > { %2315 = shalt.err (!%p2312_p7)
}
 0x1ea   : > { %s2454_s24 = smov 128   ;;  %s2455_s12 = smov 8  }
 0x1eb   : > { %1987 = dma.vmem_to_hbm [thread:$0]  (%p2683_p5), %s1657_s13, 2048, %s1659_s15, %s1641_s0, %s2454_s24, %s2454_s24, %s2455_s12  }
 0x1ec PF: > { %p2015_p6 = scmp.ge.s32.totalorder %s2446_s10, 2  ;;  %s1673_s11 = sand.u32 1, %s2418_s27  }
 0x1ed   : > { %s1674_s5 = scalar_lea.sflag [#allocation4], %s1673_s11 }
 0x1ee   : > { %p2007_p3 = pnand %p2015_p6, %p2687_p11 }
 0x1f0   : > { %p2008_p2 = pneg %p2007_p3 }
 0x1f2   : > { %2389 = dma.done.wait (%p2008_p2), %s1674_s5, 2048  }
 0x1f3   : > { %2391 = vsyncadd (%p2008_p2), %s1674_s5, 4294965248  ;;  %s26_s10 = sadd.s32 1, %s2446_s10   ;;  %s3732_s24 = sld [smem:[#allocation18_spill]] }
 0x1f4   : > { %p3492_p8 = scmp.ge.s32.totalorder %s26_s10, 6   ;;  %s3733_s25 = sld [smem:[#allocation19_spill]] }
 0x1f5   : > { %s3734_s26 = sld [smem:[#allocation30_spill]]  ;;  %s3741_s21 = smov %s2398_s22 }
 0x1f6   : > { %s3735_s7 = sld [smem:[#allocation20_spill]]  ;;  %s3742_s22 = smov %s2402_s23 }
 0x1f7   : > { %s3736_s29 = sld [smem:[#allocation31_spill]]  ;;  %s3743_s23 = smov %s2730_s3 }
 0x1f8   : > { %s3737_s30 = sld [smem:[#allocation23_spill]]  ;;  %s3744_s27 = smov %s2422_s28 }
 0x1f9   : > { %s3738_s6 = sld [smem:[#allocation24_spill]] }
 0x1fa   : > { %s3739_s8 = sld [smem:[#allocation26_spill]] }
 0x1fb   : > { %s3740_s9 = sld [smem:[#allocation27_spill]]  ;;  %25 = sbr.rel (!%p3492_p8) target bundleno = 21 (0x15), region = 121 }
 0x1fc   : > { %s3745_s28 = smov %s3735_s7 }
 0x1ff   : > { %s3746_s7 = smov %s3738_s6 }
 0x200   :  { %1680 = vsyncpa [#allocation3], 1 }
 0x201   :  { %1682 = vsyncpa [#allocation3 + $0x1], 1 }
 0x202   :  { %1683 = vsyncpa [#allocation6], 1 }
 0x203   :  { %1685 = vsyncpa [#allocation6 + $0x1], 1 }
 0x204   :  { %1686 = vsyncpa [#allocation9], 1 }
 0x205   :  { %1687 = vsyncpa [#allocation4], 1 }
 0x206   :  { %1689 = vsyncpa [#allocation4 + $0x1], 1 }

</bundles_post_ra>
